<compile_context>
chip_gen: v7x
topology: tpu7x:2x2x1
jax: 0.10.0
libtpu: 0.0.40
codegen_flags: <defaults>
</compile_context>

<pallas_src>
import functools

import jax
import jax.numpy as jnp
from jax.experimental import pallas as pl
from jax.experimental.pallas import tpu as pltpu

F32 = jnp.float32
BF16 = jnp.bfloat16

# RReLU in eval mode == leaky_relu with slope (lower + upper) / 2 = (1/8 + 1/3)/2.
# TODO(synk): training-mode RReLU samples a random slope per element; the
# deterministic eval-mode behaviour is used here.
RRELU_SLOPE = (1.0 / 8.0 + 1.0 / 3.0) / 2.0

VMEM = pl.BlockSpec(memory_space=pltpu.MemorySpace.VMEM)
CPARAMS = pltpu.CompilerParams(vmem_limit_bytes=64 * 1024 * 1024)


# ------------------------------ Pallas kernels ------------------------------

def make_encoder_kernel(num_rel, use_past):
    """Fused REGCN encoder: 2x (HeteroConv(SAGE, aggr='mean') + RReLU + time gate)
    plus the batched relation-representation update (Linear at snap 0, GRUCell after).

    Host-side preprocessing folded into the inputs:
      adj_ref   : bf16, already row-normalized by max(in-degree, 1),
      wl*_ref   : per-relation lin_l weights pre-scaled by 1/num_rel,
      wr*_ref   : sum_r lin_r[r] / num_rel, bl*_ref : sum_r bias[r] / num_rel,
      degn_ref  : (R, N) per-relation dst-degree / max(#edges, 1).
    """

    def kernel(*refs):
        if use_past:
            (x_ref, adj_ref, degn_ref, past1_ref, past2_ref, pastR_ref,
             wl1_ref, wr1_ref, bl1_ref, wg1_ref, bg1_ref,
             wl2_ref, wr2_ref, bl2_ref, wg2_ref, bg2_ref,
             relemb_ref, gwia_ref, gwib_ref, gwh_ref, gbi_ref, gbh_ref,
             cur1_ref, cur2_ref, curR_ref) = refs
        else:
            (x_ref, adj_ref, degn_ref,
             wl1_ref, wr1_ref, bl1_ref,
             wl2_ref, wr2_ref, bl2_ref,
             relemb_ref, lra_ref, lrb_ref, lrbias_ref,
             cur1_ref, cur2_ref, curR_ref) = refs

        def hetero_sage(h_in, wl_ref, wrs_ref, bls_ref):
            # lin_r / bias terms are linear in r -> pre-summed on host (one matmul).
            acc = (jnp.dot(h_in, wrs_ref[...], preferred_element_type=jnp.float32)
                   + bls_ref[...])
            hb = h_in.astype(BF16)  # bf16 MXU path for the (N,N)@(N,F) aggregation
            # TODO(synk): for large num_rel replace this static unroll with a
            # relation grid axis so only one adjacency tile is VMEM-resident.
            for r in range(num_rel):
                agg = jnp.dot(adj_ref[r], hb, preferred_element_type=jnp.float32)
                acc = acc + jnp.dot(agg, wl_ref[r], preferred_element_type=jnp.float32)
            # self.act = RReLU() (eval-mode slope)
            return jnp.where(acc >= 0.0, acc, RRELU_SLOPE * acc)

        x = x_ref[...]

        # ---- layer 1 -------------------------------------------------------
        out1 = hetero_sage(x, wl1_ref, wr1_ref, bl1_ref)
        if use_past:
            # TODO(synk): HetNodeUpdateGate source is not provided; implemented as the
            # RE-GCN time gate: u = sigmoid(W h_t + b), h = u*h_t + (1-u)*h_{t-1}.
            u1 = jax.nn.sigmoid(
                jnp.dot(out1, wg1_ref[...], preferred_element_type=jnp.float32)
                + bg1_ref[...])
            cur1 = u1 * out1 + (1.0 - u1) * past1_ref[...]
        else:
            cur1 = out1
        cur1_ref[...] = cur1

        # ---- layer 2 -------------------------------------------------------
        out2 = hetero_sage(cur1, wl2_ref, wr2_ref, bl2_ref)
        if use_past:
            u2 = jax.nn.sigmoid(
                jnp.dot(out2, wg2_ref[...], preferred_element_type=jnp.float32)
                + bg2_ref[...])
            cur2 = u2 * out2 + (1.0 - u2) * past2_ref[...]
        else:
            cur2 = out2
        cur2_ref[...] = cur2

        # ---- relation representations, batched over all relations ---------
        # avg[r] = mean over edges of relation r of cur2[dst]  -> one matmul.
        avg = jnp.dot(degn_ref[...], cur2, preferred_element_type=jnp.float32)  # (R, H2)
        rel = relemb_ref[...]                                                   # (R, H2)

        if not use_past:
            # current_R = linr([avg | rel_emb])  (Linear(2*H2 -> H2), weights pre-split)
            curR = (jnp.dot(avg, lra_ref[...], preferred_element_type=jnp.float32)
                    + jnp.dot(rel, lrb_ref[...], preferred_element_type=jnp.float32)
                    + lrbias_ref[...])
        else:
            # current_R = GRUCell([avg | rel_emb], past_R); gates stacked [r|z|n].
            h = rel.shape[-1]
            pR = pastR_ref[...]
            gi = (jnp.dot(avg, gwia_ref[...], preferred_element_type=jnp.float32)
                  + jnp.dot(rel, gwib_ref[...], preferred_element_type=jnp.float32)
                  + gbi_ref[...])                                                # (R, 3H)
            gh = (jnp.dot(pR, gwh_ref[...], preferred_element_type=jnp.float32)
                  + gbh_ref[...])                                                # (R, 3H)
            rr = jax.nn.sigmoid(gi[:, :h] + gh[:, :h])
            zz = jax.nn.sigmoid(gi[:, h:2 * h] + gh[:, h:2 * h])
            nn = jnp.tanh(gi[:, 2 * h:] + rr * gh[:, 2 * h:])
            curR = (1.0 - zz) * nn + zz * pR

        curR_ref[...] = curR     # single dense (R, H2) store

    return kernel


def link_kernel(headRT_ref, tailRT_ref, curR_ref, whT_ref, bhT_ref,
                wrt_ref, br_ref, w1mT_ref, w3mT_ref, sselT_ref, aggT_ref,
                w2col_ref, bsum_ref, o_ref):
    """Batched link-prediction head for ALL relations in one shot.

    Faithfully reproduces (per relation):
      head_conv = conv_h(head.reshape(H2, E)).reshape(E, OC)
      tail_conv = conv_h(tail.reshape(H2, E)).reshape(E, OC)   (conv_h reused, as in the original)
      rel_conv  = conv_r(rel.T).T repeated over E
      h = sum(post(cat(head_conv, rel_conv, tail_conv)), dim=-1)
    The post Linear is pre-summed over its 2 logits on the host; the quirky
    second reshape + dot is expressed as precomputed elementwise weight masks
    (w1mT/w3mT) plus block-sum matrices (sselT/aggT), so no in-kernel reshape
    or transpose is needed. Requires output_conv % num_edge_labels == 0.
    """
    chT = (jnp.dot(headRT_ref[...], whT_ref[...], preferred_element_type=jnp.float32)
           + bhT_ref[...])                                             # (R*E, OC)
    ctT = (jnp.dot(tailRT_ref[...], whT_ref[...], preferred_element_type=jnp.float32)
           + bhT_ref[...])                                             # (R*E, OC)
    zT = chT * w1mT_ref[...] + ctT * w3mT_ref[...]                     # (R*E, OC)
    core = jnp.dot(
        sselT_ref[...],
        jnp.dot(zT, aggT_ref[...], preferred_element_type=jnp.float32),
        preferred_element_type=jnp.float32)                           # (R, E)
    relc = (jnp.dot(curR_ref[...], wrt_ref[...], preferred_element_type=jnp.float32)
            + br_ref[...])                                             # (R, OC)
    relscal = jnp.dot(relc, w2col_ref[...], preferred_element_type=jnp.float32)  # (R, 1)
    o_ref[...] = core + relscal + bsum_ref[...]                        # single dense store


# ------------------------------ jitted forward ------------------------------

@functools.partial(jax.jit, static_argnames=("snap",))
def regcn_forward(params, x, adj, edge_label_index, past1, past2, pastR, *, snap):
    num_rel, n, _ = adj.shape
    h1 = params["gate1_w"].shape[0]
    h2 = params["gate2_w"].shape[0]
    oc = params["conv_h_w"].shape[0]
    e_lbl = edge_label_index.shape[-1]
    use_past = snap != 0
    scale = 1.0 / float(num_rel)

    # ---- host-side pre-processing (traced once per jit, all tiny) ----------
    deg = jnp.sum(adj, axis=-1)                                        # (R, N) in-degree
    adj_norm = (adj / jnp.maximum(deg, 1.0)[..., None]).astype(BF16)   # row-normalized bf16
    tot = jnp.sum(deg, axis=-1, keepdims=True)                         # (R, 1) #edges per rel
    deg_norm = deg / jnp.maximum(tot, 1.0)                             # (R, N)

    wl1 = params["conv1_wl"] * scale
    wr1s = jnp.sum(params["conv1_wr"], axis=0) * scale                 # (F, H1)
    bl1s = jnp.sum(params["conv1_bl"], axis=0) * scale                 # (1, H1)
    wl2 = params["conv2_wl"] * scale
    wr2s = jnp.sum(params["conv2_wr"], axis=0) * scale
    bl2s = jnp.sum(params["conv2_bl"], axis=0) * scale

    # ---- fused GNN encoder + relation update (one pallas_call) -------------
    if use_past:
        args1 = (x, adj_norm, deg_norm, past1, past2, pastR,
                 wl1, wr1s, bl1s, params["gate1_w"], params["gate1_b"],
                 wl2, wr2s, bl2s, params["gate2_w"], params["gate2_b"],
                 params["rel_emb"],
                 params["gru_wi_avg"], params["gru_wi_rel"], params["gru_wh"],
                 params["gru_bi"], params["gru_bh"])
    else:
        args1 = (x, adj_norm, deg_norm,
                 wl1, wr1s, bl1s,
                 wl2, wr2s, bl2s,
                 params["rel_emb"],
                 params["linr_wa"], params["linr_wb"], params["linr_b"])

    cur1, cur2, curR = pl.pallas_call(
        make_encoder_kernel(num_rel, use_past),
        out_shape=(
            jax.ShapeDtypeStruct((n, h1), F32),
            jax.ShapeDtypeStruct((n, h2), F32),
            jax.ShapeDtypeStruct((num_rel, h2), F32),
        ),
        in_specs=[VMEM] * len(args1),
        out_specs=(VMEM, VMEM, VMEM),
        compiler_params=CPARAMS,
    )(*args1)

    # ---- link prediction head (batched over relations, gathers in XLA glue) ----
    if oc % e_lbl != 0:
        # TODO(synk): the block-sum formulation assumes output_conv % num_edge_labels == 0;
        # the fully general case would need an in-kernel reshape.
        raise ValueError("output_conv must be a multiple of the edge-label count")
    m = oc // e_lbl

    # TODO(synk): could be fused into the encoder kernel via scalar-prefetched
    # edge indices; kept as glue because of the raw reshape(H2, E) quirk below.
    gathered_h = jnp.take(cur2, edge_label_index[:, 0], axis=0)        # (R, E, H2)
    gathered_t = jnp.take(cur2, edge_label_index[:, 1], axis=0)
    # faithful to the original: a raw .reshape(H2, E) (NOT a transpose), then a
    # transpose so the kernel can run fully row-major with no in-kernel reshapes.
    headRT = gathered_h.reshape(num_rel, h2, e_lbl).transpose(0, 2, 1) \
                       .reshape(num_rel * e_lbl, h2)
    tailRT = gathered_t.reshape(num_rel, h2, e_lbl).transpose(0, 2, 1) \
                       .reshape(num_rel * e_lbl, h2)

    # sum(post(concat), dim=-1) == concat @ sum(W_post, 0) + sum(b_post)
    wsum = jnp.sum(params["post_w"], axis=0)                           # (3*OC,)
    bsum = jnp.sum(params["post_b"]).reshape(1, 1)
    w1, w2, w3 = wsum[:oc], wsum[oc:2 * oc], wsum[2 * oc:]
    # reshape(E, OC) of a (OC, E) conv output followed by the dot with w ==
    # elementwise weight mask + block-sum over groups of m rows:
    oidx = (jnp.arange(oc)[:, None] % m) * e_lbl + jnp.arange(e_lbl)[None, :]
    w1mT = jnp.tile(w1[oidx].T, (num_rel, 1))                          # (R*E, OC)
    w3mT = jnp.tile(w3[oidx].T, (num_rel, 1))
    sselT = (jnp.arange(num_rel * e_lbl)[None, :] // e_lbl ==
             jnp.arange(num_rel)[:, None]).astype(F32)                 # (R, R*E)
    aggT = (jnp.arange(oc)[:, None] // m ==
            jnp.arange(e_lbl)[None, :]).astype(F32)                    # (OC, E)

    args2 = (headRT, tailRT, curR,
             params["conv_h_w"].T, params["conv_h_b"].reshape(1, oc),
             params["conv_r_wt"], params["conv_r_b"],
             w1mT, w3mT, sselT, aggT, w2.reshape(oc, 1), bsum)
    h = pl.pallas_call(
        link_kernel,
        out_shape=jax.ShapeDtypeStruct((num_rel, e_lbl), F32),
        in_specs=[VMEM] * len(args2),
        out_specs=VMEM,
        compiler_params=CPARAMS,
    )(*args2)

    return h, cur1, cur2, curR


# ------------------------------ parameter init ------------------------------

def init_params(key, f_in, h1, h2, oc, num_rel):
    keys = iter(jax.random.split(key, 16))

    def w(shape, scale=0.1):
        return (scale * jax.random.normal(next(keys), shape)).astype(F32)

    def zeros(shape):
        return jnp.zeros(shape, F32)

    return {
        # conv1/conv2: one SAGEConv per edge type (lin_l with bias, lin_r no bias)
        "conv1_wl": w((num_rel, f_in, h1)),
        "conv1_bl": zeros((num_rel, 1, h1)),
        "conv1_wr": w((num_rel, f_in, h1)),
        "gate1_w": w((h1, h1)),
        "gate1_b": zeros((1, h1)),
        "conv2_wl": w((num_rel, h1, h2)),
        "conv2_bl": zeros((num_rel, 1, h2)),
        "conv2_wr": w((num_rel, h1, h2)),
        "gate2_w": w((h2, h2)),
        "gate2_b": zeros((1, h2)),
        "rel_emb": w((num_rel, h2), scale=1.0),
        # linr: Linear(2*H2 -> H2), weights pre-split by input half (avg | rel_emb)
        "linr_wa": w((h2, h2)),
        "linr_wb": w((h2, h2)),
        "linr_b": zeros((1, h2)),
        # GRUCell(2*H2 -> H2): gates stacked along the output axis as [r | z | n],
        # input weights split by input half, stored pre-transposed for x @ W.
        "gru_wi_avg": w((h2, 3 * h2)),
        "gru_wi_rel": w((h2, 3 * h2)),
        "gru_wh": w((h2, 3 * h2)),
        "gru_bi": zeros((1, 3 * h2)),
        "gru_bh": zeros((1, 3 * h2)),
        # conv_h / conv_r / conv_t: Conv1d(H2 -> OC, kernel_size=1)
        "conv_h_w": w((oc, h2)),
        "conv_h_b": zeros((oc, 1)),
        "conv_r_wt": w((h2, oc)),
        "conv_r_b": zeros((1, oc)),
        "conv_t_w": w((oc, h2)),   # defined but unused (the original forward never uses conv_t)
        "conv_t_b": zeros((oc, 1)),
        "post_w": w((2, 3 * oc)),
        "post_b": zeros((2,)),
    }


if __name__ == "__main__":
    N, F_IN, H1, H2 = 16, 16, 32, 32
    OUTPUT_CONV = 16
    NUM_REL, NUM_EDGE_LABEL = 2, 8        # OUTPUT_CONV % NUM_EDGE_LABEL == 0

    key = jax.random.PRNGKey(0)
    k_param, k_x0, k_x1, k_adj, k_eli = jax.random.split(key, 5)
    params = init_params(k_param, F_IN, H1, H2, OUTPUT_CONV, NUM_REL)

    x_snap0 = jax.random.normal(k_x0, (N, F_IN), F32)
    x_snap1 = jax.random.normal(k_x1, (N, F_IN), F32)
    adj = jax.random.bernoulli(k_adj, 0.3, (NUM_REL, N, N)).astype(F32)
    edge_label_index = jax.random.randint(
        k_eli, (NUM_REL, 2, NUM_EDGE_LABEL), 0, N, dtype=jnp.int32)

    zero1 = jnp.zeros((N, H1), F32)
    zero2 = jnp.zeros((N, H2), F32)
    zeroR = jnp.zeros((NUM_REL, H2), F32)

    # snapshot 0: no time gates / relation GRU, current_R = linr(R)
    h0, cur1_0, cur2_0, R0 = regcn_forward(
        params, x_snap0, adj, edge_label_index, zero1, zero2, zeroR, snap=0)
    # snapshot 1: time gates against snapshot-0 embeddings + GRU relation update
    h1, cur1_1, cur2_1, R1 = regcn_forward(
        params, x_snap1, adj, edge_label_index, cur1_0, cur2_0, R0, snap=1)

    jax.block_until_ready((h0, h1, cur1_1, cur2_1, R1))
    h_dict = {r: h1[r] for r in range(NUM_REL)}   # per-edge-type logits (sum over the 2 post outputs)

    assert h0.shape == (NUM_REL, NUM_EDGE_LABEL)
    assert h_dict[0].shape == (NUM_EDGE_LABEL,)
    assert cur1_1.shape == (N, H1) and cur2_1.shape == (N, H2)
    assert R1.shape == (NUM_REL, H2)
    assert bool(jnp.all(jnp.isfinite(h0))) and bool(jnp.all(jnp.isfinite(h1)))
    assert bool(jnp.all(jnp.isfinite(cur2_1))) and bool(jnp.all(jnp.isfinite(R1)))
    print("KERNEL_OK")
</pallas_src>

<mosaic_0001>
module attributes {stable_mosaic.version = 11 : i64} {
  func.func @kernel(%arg0: memref<16x16xf32, #tpu.memory_space<vmem>>, %arg1: memref<2x16x16xbf16, #tpu.memory_space<vmem>>, %arg2: memref<2x16xf32, #tpu.memory_space<vmem>>, %arg3: memref<2x16x32xf32, #tpu.memory_space<vmem>>, %arg4: memref<16x32xf32, #tpu.memory_space<vmem>>, %arg5: memref<1x32xf32, #tpu.memory_space<vmem>>, %arg6: memref<2x32x32xf32, #tpu.memory_space<vmem>>, %arg7: memref<32x32xf32, #tpu.memory_space<vmem>>, %arg8: memref<1x32xf32, #tpu.memory_space<vmem>>, %arg9: memref<2x32xf32, #tpu.memory_space<vmem>>, %arg10: memref<32x32xf32, #tpu.memory_space<vmem>>, %arg11: memref<32x32xf32, #tpu.memory_space<vmem>>, %arg12: memref<1x32xf32, #tpu.memory_space<vmem>>, %arg13: memref<16x32xf32, #tpu.memory_space<vmem>>, %arg14: memref<16x32xf32, #tpu.memory_space<vmem>>, %arg15: memref<2x32xf32, #tpu.memory_space<vmem>>) attributes {dimension_semantics = [], scalar_prefetch = 0 : i64, scratch_operands = 0 : i64, tpu.core_type = #tpu.core_type<tc>} {
    %c0 = arith.constant 0 : index
    %c0_0 = arith.constant 0 : index
    %0 = vector.load %arg0[%c0, %c0_0] : memref<16x16xf32, #tpu.memory_space<vmem>>, vector<16x16xf32>
    %c0_1 = arith.constant 0 : index
    %c0_2 = arith.constant 0 : index
    %1 = vector.load %arg4[%c0_1, %c0_2] : memref<16x32xf32, #tpu.memory_space<vmem>>, vector<16x32xf32>
    %cst = arith.constant dense<0.000000e+00> : vector<16x32xf32>
    %2 = tpu.matmul %0, %1, %cst {dimension_numbers = #tpu.dot_dimension_numbers<[1], [0], [0], [1], [0, 0, 1, 1], [], []>} : vector<16x16xf32>, vector<16x32xf32>, vector<16x32xf32> -> vector<16x32xf32>
    %c0_3 = arith.constant 0 : index
    %c0_4 = arith.constant 0 : index
    %3 = vector.load %arg5[%c0_3, %c0_4] : memref<1x32xf32, #tpu.memory_space<vmem>>, vector<1x32xf32>
    %4 = vector.broadcast %3 : vector<1x32xf32> to vector<16x32xf32>
    %5 = arith.addf %2, %4 : vector<16x32xf32>
    %6 = arith.truncf %0 : vector<16x16xf32> to vector<16x16xbf16>
    %c0_5 = arith.constant 0 : index
    %c0_6 = arith.constant 0 : index
    %c0_7 = arith.constant 0 : index
    %7 = vector.load %arg1[%c0_5, %c0_6, %c0_7] : memref<2x16x16xbf16, #tpu.memory_space<vmem>>, vector<1x16x16xbf16>
    %8 = vector.shape_cast %7 : vector<1x16x16xbf16> to vector<16x16xbf16>
    %cst_8 = arith.constant dense<0.000000e+00> : vector<16x16xf32>
    %9 = tpu.matmul %8, %6, %cst_8 {dimension_numbers = #tpu.dot_dimension_numbers<[1], [0], [0], [1], [0, 0, 1, 1], [], []>} : vector<16x16xbf16>, vector<16x16xbf16>, vector<16x16xf32> -> vector<16x16xf32>
    %c0_9 = arith.constant 0 : index
    %c0_10 = arith.constant 0 : index
    %c0_11 = arith.constant 0 : index
    %10 = vector.load %arg3[%c0_9, %c0_10, %c0_11] : memref<2x16x32xf32, #tpu.memory_space<vmem>>, vector<1x16x32xf32>
    %11 = vector.shape_cast %10 : vector<1x16x32xf32> to vector<16x32xf32>
    %cst_12 = arith.constant dense<0.000000e+00> : vector<16x32xf32>
    %12 = tpu.matmul %9, %11, %cst_12 {dimension_numbers = #tpu.dot_dimension_numbers<[1], [0], [0], [1], [0, 0, 1, 1], [], []>} : vector<16x16xf32>, vector<16x32xf32>, vector<16x32xf32> -> vector<16x32xf32>
    %13 = arith.addf %5, %12 : vector<16x32xf32>
    %c1 = arith.constant 1 : index
    %c0_13 = arith.constant 0 : index
    %c0_14 = arith.constant 0 : index
    %14 = vector.load %arg1[%c1, %c0_13, %c0_14] : memref<2x16x16xbf16, #tpu.memory_space<vmem>>, vector<1x16x16xbf16>
    %15 = vector.shape_cast %14 : vector<1x16x16xbf16> to vector<16x16xbf16>
    %cst_15 = arith.constant dense<0.000000e+00> : vector<16x16xf32>
    %16 = tpu.matmul %15, %6, %cst_15 {dimension_numbers = #tpu.dot_dimension_numbers<[1], [0], [0], [1], [0, 0, 1, 1], [], []>} : vector<16x16xbf16>, vector<16x16xbf16>, vector<16x16xf32> -> vector<16x16xf32>
    %c1_16 = arith.constant 1 : index
    %c0_17 = arith.constant 0 : index
    %c0_18 = arith.constant 0 : index
    %17 = vector.load %arg3[%c1_16, %c0_17, %c0_18] : memref<2x16x32xf32, #tpu.memory_space<vmem>>, vector<1x16x32xf32>
    %18 = vector.shape_cast %17 : vector<1x16x32xf32> to vector<16x32xf32>
    %cst_19 = arith.constant dense<0.000000e+00> : vector<16x32xf32>
    %19 = tpu.matmul %16, %18, %cst_19 {dimension_numbers = #tpu.dot_dimension_numbers<[1], [0], [0], [1], [0, 0, 1, 1], [], []>} : vector<16x16xf32>, vector<16x32xf32>, vector<16x32xf32> -> vector<16x32xf32>
    %20 = arith.addf %13, %19 : vector<16x32xf32>
    %cst_20 = arith.constant 0.000000e+00 : f32
    %21 = vector.broadcast %cst_20 : f32 to vector<16x32xf32>
    %22 = arith.cmpf oge, %20, %21 : vector<16x32xf32>
    %cst_21 = arith.constant 0.229166672 : f32
    %23 = vector.broadcast %cst_21 : f32 to vector<16x32xf32>
    %24 = arith.mulf %23, %20 : vector<16x32xf32>
    %25 = arith.select %22, %20, %24 : vector<16x32xi1>, vector<16x32xf32>
    %c0_22 = arith.constant 0 : index
    %c0_23 = arith.constant 0 : index
    %26 = vector.load %arg13[%c0_22, %c0_23] : memref<16x32xf32, #tpu.memory_space<vmem>>, vector<16x32xf32>
    tpu.vector_store %arg13[%c0_22, %c0_23], %25 {strides = array<i32>} : memref<16x32xf32, #tpu.memory_space<vmem>>, vector<16x32xf32>,
    %c0_24 = arith.constant 0 : index
    %c0_25 = arith.constant 0 : index
    %27 = vector.load %arg7[%c0_24, %c0_25] : memref<32x32xf32, #tpu.memory_space<vmem>>, vector<32x32xf32>
    %cst_26 = arith.constant dense<0.000000e+00> : vector<16x32xf32>
    %28 = tpu.matmul %25, %27, %cst_26 {dimension_numbers = #tpu.dot_dimension_numbers<[1], [0], [0], [1], [0, 0, 1, 1], [], []>} : vector<16x32xf32>, vector<32x32xf32>, vector<16x32xf32> -> vector<16x32xf32>
    %c0_27 = arith.constant 0 : index
    %c0_28 = arith.constant 0 : index
    %29 = vector.load %arg8[%c0_27, %c0_28] : memref<1x32xf32, #tpu.memory_space<vmem>>, vector<1x32xf32>
    %30 = vector.broadcast %29 : vector<1x32xf32> to vector<16x32xf32>
    %31 = arith.addf %28, %30 : vector<16x32xf32>
    %32 = arith.truncf %25 : vector<16x32xf32> to vector<16x32xbf16>
    %c0_29 = arith.constant 0 : index
    %c0_30 = arith.constant 0 : index
    %c0_31 = arith.constant 0 : index
    %33 = vector.load %arg1[%c0_29, %c0_30, %c0_31] : memref<2x16x16xbf16, #tpu.memory_space<vmem>>, vector<1x16x16xbf16>
    %34 = vector.shape_cast %33 : vector<1x16x16xbf16> to vector<16x16xbf16>
    %cst_32 = arith.constant dense<0.000000e+00> : vector<16x32xf32>
    %35 = tpu.matmul %34, %32, %cst_32 {dimension_numbers = #tpu.dot_dimension_numbers<[1], [0], [0], [1], [0, 0, 1, 1], [], []>} : vector<16x16xbf16>, vector<16x32xbf16>, vector<16x32xf32> -> vector<16x32xf32>
    %c0_33 = arith.constant 0 : index
    %c0_34 = arith.constant 0 : index
    %c0_35 = arith.constant 0 : index
    %36 = vector.load %arg6[%c0_33, %c0_34, %c0_35] : memref<2x32x32xf32, #tpu.memory_space<vmem>>, vector<1x32x32xf32>
    %37 = vector.shape_cast %36 : vector<1x32x32xf32> to vector<32x32xf32>
    %cst_36 = arith.constant dense<0.000000e+00> : vector<16x32xf32>
    %38 = tpu.matmul %35, %37, %cst_36 {dimension_numbers = #tpu.dot_dimension_numbers<[1], [0], [0], [1], [0, 0, 1, 1], [], []>} : vector<16x32xf32>, vector<32x32xf32>, vector<16x32xf32> -> vector<16x32xf32>
    %39 = arith.addf %31, %38 : vector<16x32xf32>
    %c1_37 = arith.constant 1 : index
    %c0_38 = arith.constant 0 : index
    %c0_39 = arith.constant 0 : index
    %40 = vector.load %arg1[%c1_37, %c0_38, %c0_39] : memref<2x16x16xbf16, #tpu.memory_space<vmem>>, vector<1x16x16xbf16>
    %41 = vector.shape_cast %40 : vector<1x16x16xbf16> to vector<16x16xbf16>
    %cst_40 = arith.constant dense<0.000000e+00> : vector<16x32xf32>
    %42 = tpu.matmul %41, %32, %cst_40 {dimension_numbers = #tpu.dot_dimension_numbers<[1], [0], [0], [1], [0, 0, 1, 1], [], []>} : vector<16x16xbf16>, vector<16x32xbf16>, vector<16x32xf32> -> vector<16x32xf32>
    %c1_41 = arith.constant 1 : index
    %c0_42 = arith.constant 0 : index
    %c0_43 = arith.constant 0 : index
    %43 = vector.load %arg6[%c1_41, %c0_42, %c0_43] : memref<2x32x32xf32, #tpu.memory_space<vmem>>, vector<1x32x32xf32>
    %44 = vector.shape_cast %43 : vector<1x32x32xf32> to vector<32x32xf32>
    %cst_44 = arith.constant dense<0.000000e+00> : vector<16x32xf32>
    %45 = tpu.matmul %42, %44, %cst_44 {dimension_numbers = #tpu.dot_dimension_numbers<[1], [0], [0], [1], [0, 0, 1, 1], [], []>} : vector<16x32xf32>, vector<32x32xf32>, vector<16x32xf32> -> vector<16x32xf32>
    %46 = arith.addf %39, %45 : vector<16x32xf32>
    %cst_45 = arith.constant 0.000000e+00 : f32
    %47 = vector.broadcast %cst_45 : f32 to vector<16x32xf32>
    %48 = arith.cmpf oge, %46, %47 : vector<16x32xf32>
    %cst_46 = arith.constant 0.229166672 : f32
    %49 = vector.broadcast %cst_46 : f32 to vector<16x32xf32>
    %50 = arith.mulf %49, %46 : vector<16x32xf32>
    %51 = arith.select %48, %46, %50 : vector<16x32xi1>, vector<16x32xf32>
    %c0_47 = arith.constant 0 : index
    %c0_48 = arith.constant 0 : index
    %52 = vector.load %arg14[%c0_47, %c0_48] : memref<16x32xf32, #tpu.memory_space<vmem>>, vector<16x32xf32>
    tpu.vector_store %arg14[%c0_47, %c0_48], %51 {strides = array<i32>} : memref<16x32xf32, #tpu.memory_space<vmem>>, vector<16x32xf32>,
    %c0_49 = arith.constant 0 : index
    %c0_50 = arith.constant 0 : index
    %53 = vector.load %arg2[%c0_49, %c0_50] : memref<2x16xf32, #tpu.memory_space<vmem>>, vector<2x16xf32>
    %cst_51 = arith.constant dense<0.000000e+00> : vector<2x32xf32>
    %54 = tpu.matmul %53, %51, %cst_51 {dimension_numbers = #tpu.dot_dimension_numbers<[1], [0], [0], [1], [0, 0, 1, 1], [], []>} : vector<2x16xf32>, vector<16x32xf32>, vector<2x32xf32> -> vector<2x32xf32>
    %c0_52 = arith.constant 0 : index
    %c0_53 = arith.constant 0 : index
    %55 = vector.load %arg9[%c0_52, %c0_53] : memref<2x32xf32, #tpu.memory_space<vmem>>, vector<2x32xf32>
    %c0_54 = arith.constant 0 : index
    %c0_55 = arith.constant 0 : index
    %56 = vector.load %arg10[%c0_54, %c0_55] : memref<32x32xf32, #tpu.memory_space<vmem>>, vector<32x32xf32>
    %cst_56 = arith.constant dense<0.000000e+00> : vector<2x32xf32>
    %57 = tpu.matmul %54, %56, %cst_56 {dimension_numbers = #tpu.dot_dimension_numbers<[1], [0], [0], [1], [0, 0, 1, 1], [], []>} : vector<2x32xf32>, vector<32x32xf32>, vector<2x32xf32> -> vector<2x32xf32>
    %c0_57 = arith.constant 0 : index
    %c0_58 = arith.constant 0 : index
    %58 = vector.load %arg11[%c0_57, %c0_58] : memref<32x32xf32, #tpu.memory_space<vmem>>, vector<32x32xf32>
    %cst_59 = arith.constant dense<0.000000e+00> : vector<2x32xf32>
    %59 = tpu.matmul %55, %58, %cst_59 {dimension_numbers = #tpu.dot_dimension_numbers<[1], [0], [0], [1], [0, 0, 1, 1], [], []>} : vector<2x32xf32>, vector<32x32xf32>, vector<2x32xf32> -> vector<2x32xf32>
    %60 = arith.addf %57, %59 : vector<2x32xf32>
    %c0_60 = arith.constant 0 : index
    %c0_61 = arith.constant 0 : index
    %61 = vector.load %arg12[%c0_60, %c0_61] : memref<1x32xf32, #tpu.memory_space<vmem>>, vector<1x32xf32>
    %62 = vector.broadcast %61 : vector<1x32xf32> to vector<2x32xf32>
    %63 = arith.addf %60, %62 : vector<2x32xf32>
    %c0_62 = arith.constant 0 : index
    %c0_63 = arith.constant 0 : index
    %64 = vector.load %arg15[%c0_62, %c0_63] : memref<2x32xf32, #tpu.memory_space<vmem>>, vector<2x32xf32>
    tpu.vector_store %arg15[%c0_62, %c0_63], %63 {strides = array<i32>} : memref<2x32xf32, #tpu.memory_space<vmem>>, vector<2x32xf32>,
    return
  }
}

module attributes {stable_mosaic.version = 11 : i64} {
  func.func @link_kernel(%arg0: memref<16x32xf32, #tpu.memory_space<vmem>>, %arg1: memref<16x32xf32, #tpu.memory_space<vmem>>, %arg2: memref<2x32xf32, #tpu.memory_space<vmem>>, %arg3: memref<32x16xf32, #tpu.memory_space<vmem>>, %arg4: memref<1x16xf32, #tpu.memory_space<vmem>>, %arg5: memref<32x16xf32, #tpu.memory_space<vmem>>, %arg6: memref<1x16xf32, #tpu.memory_space<vmem>>, %arg7: memref<16x16xf32, #tpu.memory_space<vmem>>, %arg8: memref<16x16xf32, #tpu.memory_space<vmem>>, %arg9: memref<2x16xf32, #tpu.memory_space<vmem>>, %arg10: memref<16x8xf32, #tpu.memory_space<vmem>>, %arg11: memref<16x1xf32, #tpu.memory_space<vmem>>, %arg12: memref<1x1xf32, #tpu.memory_space<vmem>>, %arg13: memref<2x8xf32, #tpu.memory_space<vmem>>) attributes {dimension_semantics = [], scalar_prefetch = 0 : i64, scratch_operands = 0 : i64, tpu.core_type = #tpu.core_type<tc>} {
    %c0 = arith.constant 0 : index
    %c0_0 = arith.constant 0 : index
    %0 = vector.load %arg0[%c0, %c0_0] : memref<16x32xf32, #tpu.memory_space<vmem>>, vector<16x32xf32>
    %c0_1 = arith.constant 0 : index
    %c0_2 = arith.constant 0 : index
    %1 = vector.load %arg3[%c0_1, %c0_2] : memref<32x16xf32, #tpu.memory_space<vmem>>, vector<32x16xf32>
    %cst = arith.constant dense<0.000000e+00> : vector<16x16xf32>
    %2 = tpu.matmul %0, %1, %cst {dimension_numbers = #tpu.dot_dimension_numbers<[1], [0], [0], [1], [0, 0, 1, 1], [], []>} : vector<16x32xf32>, vector<32x16xf32>, vector<16x16xf32> -> vector<16x16xf32>
    %c0_3 = arith.constant 0 : index
    %c0_4 = arith.constant 0 : index
    %3 = vector.load %arg4[%c0_3, %c0_4] : memref<1x16xf32, #tpu.memory_space<vmem>>, vector<1x16xf32>
    %4 = vector.broadcast %3 : vector<1x16xf32> to vector<16x16xf32>
    %5 = arith.addf %2, %4 : vector<16x16xf32>
    %c0_5 = arith.constant 0 : index
    %c0_6 = arith.constant 0 : index
    %6 = vector.load %arg1[%c0_5, %c0_6] : memref<16x32xf32, #tpu.memory_space<vmem>>, vector<16x32xf32>
    %c0_7 = arith.constant 0 : index
    %c0_8 = arith.constant 0 : index
    %7 = vector.load %arg3[%c0_7, %c0_8] : memref<32x16xf32, #tpu.memory_space<vmem>>, vector<32x16xf32>
    %cst_9 = arith.constant dense<0.000000e+00> : vector<16x16xf32>
    %8 = tpu.matmul %6, %7, %cst_9 {dimension_numbers = #tpu.dot_dimension_numbers<[1], [0], [0], [1], [0, 0, 1, 1], [], []>} : vector<16x32xf32>, vector<32x16xf32>, vector<16x16xf32> -> vector<16x16xf32>
    %c0_10 = arith.constant 0 : index
    %c0_11 = arith.constant 0 : index
    %9 = vector.load %arg4[%c0_10, %c0_11] : memref<1x16xf32, #tpu.memory_space<vmem>>, vector<1x16xf32>
    %10 = vector.broadcast %9 : vector<1x16xf32> to vector<16x16xf32>
    %11 = arith.addf %8, %10 : vector<16x16xf32>
    %c0_12 = arith.constant 0 : index
    %c0_13 = arith.constant 0 : index
    %12 = vector.load %arg7[%c0_12, %c0_13] : memref<16x16xf32, #tpu.memory_space<vmem>>, vector<16x16xf32>
    %13 = arith.mulf %5, %12 : vector<16x16xf32>
    %c0_14 = arith.constant 0 : index
    %c0_15 = arith.constant 0 : index
    %14 = vector.load %arg8[%c0_14, %c0_15] : memref<16x16xf32, #tpu.memory_space<vmem>>, vector<16x16xf32>
    %15 = arith.mulf %11, %14 : vector<16x16xf32>
    %16 = arith.addf %13, %15 : vector<16x16xf32>
    %c0_16 = arith.constant 0 : index
    %c0_17 = arith.constant 0 : index
    %17 = vector.load %arg9[%c0_16, %c0_17] : memref<2x16xf32, #tpu.memory_space<vmem>>, vector<2x16xf32>
    %c0_18 = arith.constant 0 : index
    %c0_19 = arith.constant 0 : index
    %18 = vector.load %arg10[%c0_18, %c0_19] : memref<16x8xf32, #tpu.memory_space<vmem>>, vector<16x8xf32>
    %cst_20 = arith.constant dense<0.000000e+00> : vector<16x8xf32>
    %19 = tpu.matmul %16, %18, %cst_20 {dimension_numbers = #tpu.dot_dimension_numbers<[1], [0], [0], [1], [0, 0, 1, 1], [], []>} : vector<16x16xf32>, vector<16x8xf32>, vector<16x8xf32> -> vector<16x8xf32>
    %cst_21 = arith.constant dense<0.000000e+00> : vector<2x8xf32>
    %20 = tpu.matmul %17, %19, %cst_21 {dimension_numbers = #tpu.dot_dimension_numbers<[1], [0], [0], [1], [0, 0, 1, 1], [], []>} : vector<2x16xf32>, vector<16x8xf32>, vector<2x8xf32> -> vector<2x8xf32>
    %c0_22 = arith.constant 0 : index
    %c0_23 = arith.constant 0 : index
    %21 = vector.load %arg2[%c0_22, %c0_23] : memref<2x32xf32, #tpu.memory_space<vmem>>, vector<2x32xf32>
    %c0_24 = arith.constant 0 : index
    %c0_25 = arith.constant 0 : index
    %22 = vector.load %arg5[%c0_24, %c0_25] : memref<32x16xf32, #tpu.memory_space<vmem>>, vector<32x16xf32>
    %cst_26 = arith.constant dense<0.000000e+00> : vector<2x16xf32>
    %23 = tpu.matmul %21, %22, %cst_26 {dimension_numbers = #tpu.dot_dimension_numbers<[1], [0], [0], [1], [0, 0, 1, 1], [], []>} : vector<2x32xf32>, vector<32x16xf32>, vector<2x16xf32> -> vector<2x16xf32>
    %c0_27 = arith.constant 0 : index
    %c0_28 = arith.constant 0 : index
    %24 = vector.load %arg6[%c0_27, %c0_28] : memref<1x16xf32, #tpu.memory_space<vmem>>, vector<1x16xf32>
    %25 = vector.broadcast %24 : vector<1x16xf32> to vector<2x16xf32>
    %26 = arith.addf %23, %25 : vector<2x16xf32>
    %c0_29 = arith.constant 0 : index
    %c0_30 = arith.constant 0 : index
    %27 = vector.load %arg11[%c0_29, %c0_30] : memref<16x1xf32, #tpu.memory_space<vmem>>, vector<16x1xf32>
    %cst_31 = arith.constant dense<0.000000e+00> : vector<2x1xf32>
    %28 = tpu.matmul %26, %27, %cst_31 {dimension_numbers = #tpu.dot_dimension_numbers<[1], [0], [0], [1], [0, 0, 1, 1], [], []>} : vector<2x16xf32>, vector<16x1xf32>, vector<2x1xf32> -> vector<2x1xf32>
    %29 = vector.broadcast %28 : vector<2x1xf32> to vector<2x8xf32>
    %30 = arith.addf %20, %29 : vector<2x8xf32>
    %c0_32 = arith.constant 0 : index
    %c0_33 = arith.constant 0 : index
    %31 = vector.load %arg12[%c0_32, %c0_33] : memref<1x1xf32, #tpu.memory_space<vmem>>, vector<1x1xf32>
    %32 = vector.broadcast %31 : vector<1x1xf32> to vector<2x8xf32>
    %33 = arith.addf %30, %32 : vector<2x8xf32>
    %c0_34 = arith.constant 0 : index
    %c0_35 = arith.constant 0 : index
    %34 = vector.load %arg13[%c0_34, %c0_35] : memref<2x8xf32, #tpu.memory_space<vmem>>, vector<2x8xf32>
    tpu.vector_store %arg13[%c0_34, %c0_35], %33 {strides = array<i32>} : memref<2x8xf32, #tpu.memory_space<vmem>>, vector<2x8xf32>,
    return
  }
}

</mosaic_0001>

<bundles_post_ra>
// kernel: regcn_forward.2
= control target key start
LH: loop header
LB: loop body
LE: loop exit
PB: predicated region body
PF: predicated region fallthrough
CT: control target
= control target key end

     0   :  { %s2269_s0 = inlined_call_operand.hbm [shape: f32[16,16], index: 0, kind: input, shape index: {}]   ;;  %s2270_s1 = inlined_call_operand.hbm [shape: bf16[2,16,16], index: 1, kind: input, shape index: {}]   ;;  %s2271_s2 = inlined_call_operand.hbm [shape: f32[2,16], index: 2, kind: input, shape index: {}]   ;;  %s2272_s3 = inlined_call_operand.hbm [shape: f32[2,16,32], index: 3, kind: input, shape index: {}]   ;;  %s2273_s4 = inlined_call_operand.hbm [shape: f32[16,32], index: 4, kind: input, shape index: {}]   ;;  %s2274_s5 = inlined_call_operand.hbm [shape: f32[1,32], index: 5, kind: input, shape index: {}]   ;;  %s2275_s6 = inlined_call_operand.hbm [shape: f32[2,32,32], index: 6, kind: input, shape index: {}]   ;;  %s2276_s7 = inlined_call_operand.hbm [shape: f32[32,32], index: 7, kind: input, shape index: {}]   ;;  %s2277_s8 = inlined_call_operand.hbm [shape: f32[1,32], index: 8, kind: input, shape index: {}]   ;;  %s2278_s9 = inlined_call_operand.hbm [shape: f32[2,32], index: 9, kind: input, shape index: {}]   ;;  %s2279_s10 = inlined_call_operand.hbm [shape: f32[32,32], index: 10, kind: input, shape index: {}]   ;;  %s2280_s11 = inlined_call_operand.hbm [shape: f32[32,32], index: 11, kind: input, shape index: {}]   ;;  %s2281_s12 = inlined_call_operand.hbm [shape: f32[1,32], index: 12, kind: input, shape index: {}]   ;;  %s2282_s13 = inlined_call_operand.hbm [shape: f32[16,32], index: 13, kind: output, shape index: {0}]   ;;  %s2283_s14 = inlined_call_operand.hbm [shape: f32[16,32], index: 14, kind: output, shape index: {1}]   ;;  %s2284_s15 = inlined_call_operand.hbm [shape: f32[2,32], index: 15, kind: output, shape index: {2}]  }
   0x1   :  { %2286 = sst [smem:[#allocation36_spill]] %s2284_s15 }
   0x2   :  { %21 = vsyncpa [#allocation3], 0 }
   0x3   :  { %22 = vsyncpa [#allocation6], 0 }
   0x4   :  { %23 = vsyncpa [#allocation9], 0 }
   0x5   :  { %24 = vsyncpa [#allocation12], 0 }
   0x6   :  { %25 = vsyncpa [#allocation15], 0 }
   0x7   :  { %26 = vsyncpa [#allocation18], 0 }
   0x8   :  { %27 = vsyncpa [#allocation21], 0 }
   0x9   :  { %28 = vsyncpa [#allocation4], 0 }
   0xa   :  { %29 = vsyncpa [#allocation25], 0  ;;  %s1906_s18 = smov [#allocation5]   ;;  %s1536_s22 = scalar_lea.hbm %s2270_s1, 256 }
   0xb   :  { %s47_s19 = sshll.u32 %s1906_s18, 4  ;;  %p1537_p0 = scmp.ne.s32.totalorder %s2270_s1, %s1536_s22  ;;  %s48_s19 = int_to_ptr.vmem [resolvable:$true] %s47_s19 }
   0xc   :  { %p1540_p1 = scmp.lt.u32.totalorder %s1536_s22, %s2270_s1 }
   0xe   :  { %p1542_p2 = pnand %p1540_p1, %p1537_p0 }
  0x10   :  { %1545 = shalt.err (!%p1542_p2)
}
  0x11   :  { %s1546_s27 = scalar_lea.vmem %s48_s19, 256  ;;  %p1551_p4 = scmp.lt.s32.totalorder %s48_s19, %s48_s19 }
  0x12   :  { %p1547_p3 = scmp.ne.s32.totalorder %s48_s19, %s1546_s27  ;;  %p1552_p5 = scmp.lt.s32.totalorder %s1546_s27, %s1546_s27 }
  0x14   :  { %p1553_p6 = por %p1552_p5, %p1551_p4 }
  0x16   :  { %p1554_p7 = pnand %p1553_p6, %p1547_p3 }
  0x18   :  { %1557 = shalt.err (!%p1554_p7)
}
  0x19   :  { %s1907_s28 = smov 64   ;;  %s1908_s29 = smov 4  }
  0x1a   :  { %53 = dma.hbm_to_vmem [thread:$0]  %s2270_s1, 256, %s48_s19, [#allocation6], %s1907_s28, %s1907_s28, %s1908_s29  }
  0x1b   :  { %s1909_s17 = smov [#allocation8]   ;;  %s1910_s20 = smov [#allocation11]  }
  0x1c   :  { %s69_s18 = sshll.u32 %s1909_s17, 4  ;;  %s94_s21 = sshll.u32 %s1910_s20, 4  ;;  %s70_s18 = int_to_ptr.vmem [resolvable:$true] %s69_s18  ;;  %s95_s21 = int_to_ptr.vmem [resolvable:$true] %s94_s21 }
  0x1d   :  { %s1558_s24 = scalar_lea.hbm %s2272_s3, 512 }
  0x1e   :  { %p1559_p8 = scmp.ne.s32.totalorder %s2272_s3, %s1558_s24  ;;  %p1562_p9 = scmp.lt.u32.totalorder %s1558_s24, %s2272_s3 }
  0x20   :  { %p1564_p10 = pnand %p1562_p9, %p1559_p8 }
  0x22   :  { %1567 = shalt.err (!%p1564_p10)
}
  0x23   :  { %s1568_s1 = scalar_lea.vmem %s70_s18, 512  ;;  %p1573_p12 = scmp.lt.s32.totalorder %s70_s18, %s70_s18 }
  0x24   :  { %p1569_p11 = scmp.ne.s32.totalorder %s70_s18, %s1568_s1  ;;  %p1574_p13 = scmp.lt.s32.totalorder %s1568_s1, %s1568_s1 }
  0x26   :  { %p1575_p0 = por %p1574_p13, %p1573_p12 }
  0x28   :  { %p1576_p1 = pnand %p1575_p0, %p1569_p11 }
  0x2a   :  { %1579 = shalt.err (!%p1576_p1)
}
  0x2b   :  { %s1911_s19 = smov 128   ;;  %s1912_s28 = smov 8  }
  0x2c   :  { %75 = dma.hbm_to_vmem [thread:$0]  %s2272_s3, 512, %s70_s18, [#allocation9], %s1911_s19, %s1911_s19, %s1912_s28  }
  0x2d   :  { %s1580_s17 = scalar_lea.hbm %s2274_s5, 16 }
  0x2e   :  { %p1581_p2 = scmp.ne.s32.totalorder %s2274_s5, %s1580_s17  ;;  %p1584_p3 = scmp.lt.u32.totalorder %s1580_s17, %s2274_s5 }
  0x30   :  { %p1586_p4 = pnand %p1584_p3, %p1581_p2 }
  0x32   :  { %1589 = shalt.err (!%p1586_p4)
}
  0x33   :  { %s1590_s25 = scalar_lea.vmem %s95_s21, 16  ;;  %s1594_s26 = scalar_lea.vmem %s95_s21, 32 }
  0x34   :  { %p1591_p5 = scmp.ne.s32.totalorder %s95_s21, %s1590_s25  ;;  %p1595_p6 = scmp.lt.s32.totalorder %s95_s21, %s95_s21 }
  0x35   :  { %p1596_p7 = scmp.lt.s32.totalorder %s1594_s26, %s1590_s25 }
  0x37   :  { %p1597_p8 = por %p1596_p7, %p1595_p6 }
  0x39   :  { %p1598_p9 = pnand %p1597_p8, %p1591_p5 }
  0x3b   :  { %1601 = shalt.err (!%p1598_p9)
}
  0x3c   :  { %97 = dma.hbm_to_vmem [thread:$0]  %s2274_s5, 16, %s95_s21, [#allocation12]  }
  0x3d   :  { %s1913_s27 = smov [#allocation14]   ;;  %s1914_s29 = smov [#allocation17]  }
  0x3e   :  { %s115_s1 = sshll.u32 %s1913_s27, 4  ;;  %s138_s30 = sshll.u32 %s1914_s29, 4  ;;  %s116_s1 = int_to_ptr.vmem [resolvable:$true] %s115_s1  ;;  %s139_s30 = int_to_ptr.vmem [resolvable:$true] %s138_s30 }
  0x3f   :  { %s1602_s17 = scalar_lea.hbm %s2276_s7, 512 }
  0x40   :  { %p1603_p10 = scmp.ne.s32.totalorder %s2276_s7, %s1602_s17  ;;  %p1606_p11 = scmp.lt.u32.totalorder %s1602_s17, %s2276_s7 }
  0x42   :  { %p1608_p12 = pnand %p1606_p11, %p1603_p10 }
  0x44   :  { %1611 = shalt.err (!%p1608_p12)
}
  0x45   :  { %s1612_s5 = scalar_lea.vmem %s116_s1, 512  ;;  %p1617_p0 = scmp.lt.s32.totalorder %s116_s1, %s116_s1 }
  0x46   :  { %p1613_p13 = scmp.ne.s32.totalorder %s116_s1, %s1612_s5  ;;  %p1618_p1 = scmp.lt.s32.totalorder %s1612_s5, %s1612_s5 }
  0x48   :  { %p1619_p2 = por %p1618_p1, %p1617_p0 }
  0x4a   :  { %p1620_p3 = pnand %p1619_p2, %p1613_p13 }
  0x4c   :  { %1623 = shalt.err (!%p1620_p3)
}
  0x4d   :  { %121 = dma.hbm_to_vmem [thread:$0]  %s2276_s7, 512, %s116_s1, [#allocation15], %s1911_s19, %s1911_s19, %s1912_s28  }
  0x4e   :  { %s1624_s18 = scalar_lea.hbm %s2278_s9, 32 }
  0x4f   :  { %p1625_p4 = scmp.ne.s32.totalorder %s2278_s9, %s1624_s18  ;;  %p1628_p5 = scmp.lt.u32.totalorder %s1624_s18, %s2278_s9 }
  0x51   :  { %p1630_p6 = pnand %p1628_p5, %p1625_p4 }
  0x53   :  { %1633 = shalt.err (!%p1630_p6)
}
  0x54   :  { %s1634_s17 = scalar_lea.vmem %s139_s30, 32  ;;  %p1639_p8 = scmp.lt.s32.totalorder %s139_s30, %s139_s30 }
  0x55   :  { %p1635_p7 = scmp.ne.s32.totalorder %s139_s30, %s1634_s17  ;;  %p1640_p9 = scmp.lt.s32.totalorder %s1634_s17, %s1634_s17 }
  0x57   :  { %p1641_p10 = por %p1640_p9, %p1639_p8 }
  0x59   :  { %p1642_p11 = pnand %p1641_p10, %p1635_p7 }
  0x5b   :  { %1645 = shalt.err (!%p1642_p11)
}
  0x5c   :  { %141 = dma.hbm_to_vmem [thread:$0]  %s2278_s9, 32, %s139_s30, [#allocation18]  }
  0x5d   :  { %s1915_s20 = smov [#allocation20]   ;;  %s1916_s23 = smov [#allocation2]  }
  0x5e   :  { %s159_s22 = sshll.u32 %s1915_s20, 4  ;;  %s35_s24 = sshll.u32 %s1916_s23, 4  ;;  %s160_s22 = int_to_ptr.vmem [resolvable:$true] %s159_s22  ;;  %s36_s24 = int_to_ptr.vmem [resolvable:$true] %s35_s24 }
  0x5f   :  { %s1646_s25 = scalar_lea.hbm %s2280_s11, 512 }
  0x60   :  { %p1647_p12 = scmp.ne.s32.totalorder %s2280_s11, %s1646_s25  ;;  %p1650_p13 = scmp.lt.u32.totalorder %s1646_s25, %s2280_s11 }
  0x62   :  { %p1652_p0 = pnand %p1650_p13, %p1647_p12 }
  0x64   :  { %1655 = shalt.err (!%p1652_p0)
}
  0x65   :  { %s1656_s9 = scalar_lea.vmem %s160_s22, 512  ;;  %p1661_p2 = scmp.lt.s32.totalorder %s160_s22, %s160_s22 }
  0x66   :  { %p1657_p1 = scmp.ne.s32.totalorder %s160_s22, %s1656_s9  ;;  %p1662_p3 = scmp.lt.s32.totalorder %s1656_s9, %s1656_s9 }
  0x68   :  { %p1663_p4 = por %p1662_p3, %p1661_p2 }
  0x6a   :  { %p1664_p5 = pnand %p1663_p4, %p1657_p1 }
  0x6c   :  { %1667 = shalt.err (!%p1664_p5)
}
  0x6d   :  { %165 = dma.hbm_to_vmem [thread:$0]  %s2280_s11, 512, %s160_s22, [#allocation21], %s1911_s19, %s1911_s19, %s1912_s28  }
  0x6e   :  { %s1668_s17 = scalar_lea.hbm %s2269_s0, 256 }
  0x6f   :  { %p1669_p6 = scmp.ne.s32.totalorder %s2269_s0, %s1668_s17  ;;  %p1672_p7 = scmp.lt.u32.totalorder %s1668_s17, %s2269_s0 }
  0x71   :  { %p1674_p8 = pnand %p1672_p7, %p1669_p6 }
  0x73   :  { %1677 = shalt.err (!%p1674_p8)
}
  0x74   :  { %s1678_s5 = scalar_lea.vmem %s36_s24, 256  ;;  %p1683_p10 = scmp.lt.s32.totalorder %s36_s24, %s36_s24 }
  0x75   :  { %p1679_p9 = scmp.ne.s32.totalorder %s36_s24, %s1678_s5  ;;  %p1684_p11 = scmp.lt.s32.totalorder %s1678_s5, %s1678_s5 }
  0x77   :  { %p1685_p12 = por %p1684_p11, %p1683_p10 }
  0x79   :  { %p1686_p13 = pnand %p1685_p12, %p1679_p9 }
  0x7b   :  { %1689 = shalt.err (!%p1686_p13)
}
  0x7c   :  { %41 = dma.hbm_to_vmem [thread:$0]  %s2269_s0, 256, %s36_s24, [#allocation3], %s1911_s19, %s1911_s19, %s1912_s28  }
  0x7d   :  { %s1917_s21 = smov [#allocation7]   ;;  %s1918_s26 = smov [#allocation10]  }
  0x7e   :  { %s60_s25 = sshll.u32 %s1917_s21, 4  ;;  %s81_s3 = sshll.u32 %s1918_s26, 4  ;;  %s61_s25 = int_to_ptr.vmem [resolvable:$true] %s60_s25  ;;  %s82_s3 = int_to_ptr.vmem [resolvable:$true] %s81_s3 }
  0x7f   :  { %s1690_s9 = scalar_lea.hbm %s2271_s2, 32 }
  0x80   :  { %p1691_p0 = scmp.ne.s32.totalorder %s2271_s2, %s1690_s9  ;;  %p1694_p1 = scmp.lt.u32.totalorder %s1690_s9, %s2271_s2 }
  0x82   :  { %p1696_p2 = pnand %p1694_p1, %p1691_p0 }
  0x84   :  { %1699 = shalt.err (!%p1696_p2)
}
  0x85   :  { %s1700_s0 = scalar_lea.vmem %s61_s25, 32  ;;  %p1705_p4 = scmp.lt.s32.totalorder %s61_s25, %s61_s25 }
  0x86   :  { %p1701_p3 = scmp.ne.s32.totalorder %s61_s25, %s1700_s0  ;;  %p1706_p5 = scmp.lt.s32.totalorder %s1700_s0, %s1700_s0 }
  0x88   :  { %p1707_p6 = por %p1706_p5, %p1705_p4 }
  0x8a   :  { %p1708_p7 = pnand %p1707_p6, %p1701_p3 }
  0x8c   :  { %1711 = shalt.err (!%p1708_p7)
}
  0x8d   :  { %63 = dma.hbm_to_vmem [thread:$0]  %s2271_s2, 32, %s61_s25, [#allocation6]  }
  0x8e   :  { %s1712_s20 = scalar_lea.hbm %s2273_s4, 256 }
  0x8f   :  { %p1713_p8 = scmp.ne.s32.totalorder %s2273_s4, %s1712_s20  ;;  %p1716_p9 = scmp.lt.u32.totalorder %s1712_s20, %s2273_s4 }
  0x91   :  { %p1718_p10 = pnand %p1716_p9, %p1713_p8 }
  0x93   :  { %1721 = shalt.err (!%p1718_p10)
}
  0x94   :  { %s1722_s21 = scalar_lea.vmem %s82_s3, 256  ;;  %p1727_p12 = scmp.lt.s32.totalorder %s82_s3, %s82_s3 }
  0x95   :  { %p1723_p11 = scmp.ne.s32.totalorder %s82_s3, %s1722_s21  ;;  %p1728_p13 = scmp.lt.s32.totalorder %s1722_s21, %s1722_s21 }
  0x97   :  { %p1729_p0 = por %p1728_p13, %p1727_p12 }
  0x99   :  { %p1730_p1 = pnand %p1729_p0, %p1723_p11 }
  0x9b   :  { %1733 = shalt.err (!%p1730_p1)
}
  0x9c   :  { %87 = dma.hbm_to_vmem [thread:$0]  %s2273_s4, 256, %s82_s3, [#allocation9], %s1911_s19, %s1911_s19, %s1912_s28  }
  0x9d   :  { %s1919_s26 = smov [#allocation13]   ;;  %s1920_s27 = smov [#allocation16]  }
  0x9e   :  { %s103_s18 = sshll.u32 %s1919_s26, 4  ;;  %s128_s9 = sshll.u32 %s1920_s27, 4  ;;  %s104_s18 = int_to_ptr.vmem [resolvable:$true] %s103_s18  ;;  %s129_s9 = int_to_ptr.vmem [resolvable:$true] %s128_s9 }
  0x9f   :  { %s1734_s15 = scalar_lea.hbm %s2275_s6, 1024 }
  0xa0   :  { %p1735_p2 = scmp.ne.s32.totalorder %s2275_s6, %s1734_s15  ;;  %p1738_p3 = scmp.lt.u32.totalorder %s1734_s15, %s2275_s6 }
  0xa2   :  { %p1740_p4 = pnand %p1738_p3, %p1735_p2 }
  0xa4   :  { %1743 = shalt.err (!%p1740_p4)
}
  0xa5   :  { %s1744_s4 = scalar_lea.vmem %s104_s18, 1024  ;;  %p1749_p6 = scmp.lt.s32.totalorder %s104_s18, %s104_s18 }
  0xa6   :  { %p1745_p5 = scmp.ne.s32.totalorder %s104_s18, %s1744_s4  ;;  %p1750_p7 = scmp.lt.s32.totalorder %s1744_s4, %s1744_s4 }
  0xa8   :  { %p1751_p8 = por %p1750_p7, %p1749_p6 }
  0xaa   :  { %p1752_p9 = pnand %p1751_p8, %p1745_p5 }
  0xac   :  { %1755 = shalt.err (!%p1752_p9)
}
  0xad   :  { %109 = dma.hbm_to_vmem [thread:$0]  %s2275_s6, 1024, %s104_s18, [#allocation12], %s1911_s19, %s1911_s19, %s1912_s28  }
  0xae   :  { %s1756_s23 = scalar_lea.hbm %s2277_s8, 16 }
  0xaf   :  { %p1757_p10 = scmp.ne.s32.totalorder %s2277_s8, %s1756_s23  ;;  %p1760_p11 = scmp.lt.u32.totalorder %s1756_s23, %s2277_s8 }
  0xb1   :  { %p1762_p12 = pnand %p1760_p11, %p1757_p10 }
  0xb3   :  { %1765 = shalt.err (!%p1762_p12)
}
  0xb4   :  { %s1766_s2 = scalar_lea.vmem %s129_s9, 16  ;;  %s1770_s25 = scalar_lea.vmem %s129_s9, 32 }
  0xb5   :  { %p1767_p13 = scmp.ne.s32.totalorder %s129_s9, %s1766_s2  ;;  %p1771_p0 = scmp.lt.s32.totalorder %s129_s9, %s129_s9 }
  0xb6   :  { %p1772_p1 = scmp.lt.s32.totalorder %s1770_s25, %s1766_s2 }
  0xb8   :  { %p1773_p2 = por %p1772_p1, %p1771_p0 }
  0xba   :  { %p1774_p3 = pnand %p1773_p2, %p1767_p13 }
  0xbc   :  { %1777 = shalt.err (!%p1774_p3)
}
  0xbd   :  { %131 = dma.hbm_to_vmem [thread:$0]  %s2277_s8, 16, %s129_s9, [#allocation15]  }
  0xbe   :  { %s1921_s18 = smov [#allocation19]   ;;  %s1922_s30 = smov [#allocation22]  }
  0xbf   :  { %s147_s27 = sshll.u32 %s1921_s18, 4  ;;  %s172_s29 = sshll.u32 %s1922_s30, 4  ;;  %s148_s27 = int_to_ptr.vmem [resolvable:$true] %s147_s27  ;;  %s173_s29 = int_to_ptr.vmem [resolvable:$true] %s172_s29 }
  0xc0   :  { %s1778_s0 = scalar_lea.hbm %s2279_s10, 512 }
  0xc1   :  { %p1779_p4 = scmp.ne.s32.totalorder %s2279_s10, %s1778_s0  ;;  %p1782_p5 = scmp.lt.u32.totalorder %s1778_s0, %s2279_s10 }
  0xc3   :  { %p1784_p6 = pnand %p1782_p5, %p1779_p4 }
  0xc5   :  { %1787 = shalt.err (!%p1784_p6)
}
  0xc6   :  { %s1788_s8 = scalar_lea.vmem %s148_s27, 512  ;;  %p1793_p8 = scmp.lt.s32.totalorder %s148_s27, %s148_s27 }
  0xc7   :  { %p1789_p7 = scmp.ne.s32.totalorder %s148_s27, %s1788_s8  ;;  %p1794_p9 = scmp.lt.s32.totalorder %s1788_s8, %s1788_s8 }
  0xc9   :  { %p1795_p10 = por %p1794_p9, %p1793_p8 }
  0xcb   :  { %p1796_p11 = pnand %p1795_p10, %p1789_p7 }
  0xcd   :  { %1799 = shalt.err (!%p1796_p11)
}
  0xce   :  { %153 = dma.hbm_to_vmem [thread:$0]  %s2279_s10, 512, %s148_s27, [#allocation18], %s1911_s19, %s1911_s19, %s1912_s28  }
  0xcf   :  { %s1800_s23 = scalar_lea.hbm %s2281_s12, 16 }
  0xd0   :  { %p1801_p12 = scmp.ne.s32.totalorder %s2281_s12, %s1800_s23  ;;  %p1804_p13 = scmp.lt.u32.totalorder %s1800_s23, %s2281_s12 }
  0xd2   :  { %p1806_p0 = pnand %p1804_p13, %p1801_p12 }
  0xd4   :  { %1809 = shalt.err (!%p1806_p0)
}
  0xd5   :  { %s1810_s2 = scalar_lea.vmem %s173_s29, 16  ;;  %s1814_s25 = scalar_lea.vmem %s173_s29, 32 }
  0xd6   :  { %p1811_p1 = scmp.ne.s32.totalorder %s173_s29, %s1810_s2  ;;  %p1815_p2 = scmp.lt.s32.totalorder %s173_s29, %s173_s29 }
  0xd7   :  { %p1816_p3 = scmp.lt.s32.totalorder %s1814_s25, %s1810_s2 }
  0xd9   :  { %p1817_p4 = por %p1816_p3, %p1815_p2 }
  0xdb   :  { %p1818_p5 = pnand %p1817_p4, %p1811_p1 }
  0xdd   :  { %1821 = shalt.err (!%p1818_p5)
}
  0xde   :  { %175 = dma.hbm_to_vmem [thread:$0]  %s2281_s12, 16, %s173_s29, [#allocation21]  }
  0xdf   :  { %1888 = dma.done.wait [#allocation3], 256  }
  0xe0   :  { %1889 = vsyncadd [#allocation3], 4294967040 }
  0xe1   :  { %1890 = dma.done.wait [#allocation6], 288  }
  0xe2   :  { %1891 = vsyncadd [#allocation6], 4294967008 }
  0xe3   :  { %1892 = dma.done.wait [#allocation9], 768  }
  0xe4   :  { %1893 = vsyncadd [#allocation9], 4294966528 }
  0xe5   :  { %1894 = dma.done.wait [#allocation12], 1040  }
  0xe6   :  { %1895 = vsyncadd [#allocation12], 4294966256 }
  0xe7   :  { %1896 = dma.done.wait [#allocation15], 528  }
  0xe8   :  { %1897 = vsyncadd [#allocation15], 4294966768 }
  0xe9   :  { %1898 = dma.done.wait [#allocation18], 544  }
  0xea   :  { %1899 = vsyncadd [#allocation18], 4294966752 }
  0xeb   :  { %1900 = dma.done.wait [#allocation21], 528  }
  0xec   :  { %1901 = vsyncadd [#allocation21], 4294966768  ;;  %v1923_v0 = vmov 0.0   ;;  %vm1924_vm0 = vmmov 0   ;;  %v216_v1 = vld [vmem:[#allocation2] sm:$0xff]  ;;  %v217_v2 = vld [vmem:[#allocation2 + $0x8] sm:$0xff] }
  0xed   :  { %1346 = vmatprep.subr.bf16.mxu1 %v1923_v0  ;;  %1348 = vmatprep.mubr.msk.bf16.mxu1 %vm1924_vm0, %v1923_v0  ;;  %vm227_vm1 = vcmask 130048   ;;  %v309_v3 = vpack.c.bf16 %v217_v2, %v216_v1  ;;  %v1532_v4 = vld [vmem:[#allocation5] sm:$0xff]   ;;  %v218_v5 = vld [vmem:[#allocation10] sm:$0xff]  ;;  %v500_v12 = vld [vmem:[#allocation8 + $0x18] sm:$0xff]  ;;  %vm590_vm3 = vcmask 261120   ;;  %v1925_v61 = vmov 0.0|0.0  }
  0xee   :  { %1343 = vmatprep.mubr.msk.f32.mxu0 %vm227_vm1, %v216_v1  ;;  %v219_v6 = vld [vmem:[#allocation10 + $0x8] sm:$0xff]  ;;  %v361_v7 = vld [vmem:[#allocation8] sm:$0xff]  ;;  %v499_v11 = vld [vmem:[#allocation8 + $0x10] sm:$0xff]  ;;  %s1926_s12 = smov [#allocation24]   ;;  %s1927_s18 = smov [#allocation23]  }
  0xef   :  { %v362_v8 = vld [vmem:[#allocation8 + $0x8] sm:$0xff]  ;;  %1347 = vmatpush3.bf16.msra.mxu1 %v309_v3  ;;  %v1446_v9 = vpack.c.bf16 %v219_v6, %v218_v5  ;;  %v1454_v15 = vpack.c.bf16 %v500_v12, %v499_v11  ;;  %v1533_v18 = vld [vmem:[#allocation5 + $0x8] sm:$0xff]   ;;  %v1262_v29 = vld [vmem:[#allocation11] ss:$0 sm:$0xff]  ;;  %s1227_s26 = sshll.u32 %s1926_s12, 4  ;;  %s1215_s27 = sshll.u32 %s1927_s18, 4  ;;  %s1228_s26 = int_to_ptr.vmem [resolvable:$true] %s1227_s26  ;;  %s1216_s27 = int_to_ptr.vmem [resolvable:$true] %s1215_s27 }
  0xf0   :  { %v1450_v10 = vpack.c.bf16 %v362_v8, %v361_v7  ;;  %v593_v23 = vld [vmem:[#allocation14] sm:$0xff]  ;;  %v594_v24 = vld [vmem:[#allocation14 + $0x8] sm:$0xff]  ;;  %v595_v26 = vld [vmem:[#allocation14 + $0x10] sm:$0xff]  ;;  %s1822_s30 = scalar_lea.vmem %s1228_s26, 256  ;;  %p1827_p7 = scmp.lt.s32.totalorder %s1228_s26, %s1228_s26 }
  0xf1   :  { %1447 = vmatprep.subr.bf16.mxu0 %v1446_v9  ;;  %v1458_v25 = vpack.c.bf16 %v594_v24, %v593_v23  ;;  %v596_v27 = vld [vmem:[#allocation14 + $0x18] sm:$0xff]  ;;  %v737_v35 = vld [vmem:[#allocation13] sm:$0xff]  ;;  %v738_v36 = vld [vmem:[#allocation13 + $0x8] sm:$0xff]  ;;  %p1823_p6 = scmp.ne.s32.totalorder %s1228_s26, %s1822_s30  ;;  %p1828_p8 = scmp.lt.s32.totalorder %s1822_s30, %s1822_s30 }
  0xf2   :  { %1349 = vmatmul.mubr.msk.bf16.vlgmr.msra.gmra.mrb[0].mxu1 %vm227_vm1, %v1532_v4  ;;  %1449 = vmatpush3.bf16.msra.mxu0 %v1446_v9  ;;  %v1462_v28 = vpack.c.bf16 %v596_v27, %v595_v26  ;;  %v1466_v40 = vpack.c.bf16 %v738_v36, %v737_v35  ;;  %v739_v42 = vld [vmem:[#allocation13 + $0x10] sm:$0xff]  ;;  %v740_v43 = vld [vmem:[#allocation13 + $0x18] sm:$0xff]  ;;  %v1535_v45 = vld [vmem:[#allocation5 + $0x8] sm:$0xff]  }
  0xf3   :  { %1451 = vmatprep.subr.bf16.mxu0 %v1450_v10  ;;  %1459 = vmatprep.subr.bf16.mxu1 %v1458_v25  ;;  %v1534_v44 = vld [vmem:[#allocation5] sm:$0xff]   ;;  %v1470_v46 = vpack.c.bf16 %v740_v43, %v739_v42  ;;  %v877_v48 = vld [vmem:[#allocation13 + $0x28] sm:$0xff]  ;;  %v878_v50 = vld [vmem:[#allocation13 + $0x30] sm:$0xff]  ;;  %p1829_p9 = por %p1828_p8, %p1827_p7 }
  0xf4   :  { %1461 = vmatpush3.bf16.msra.mxu1 %v1458_v25  ;;  %v876_v47 = vld [vmem:[#allocation13 + $0x20] sm:$0xff]  ;;  %v879_v51 = vld [vmem:[#allocation13 + $0x38] sm:$0xff]  ;;  %v1047_v63 = vld [vmem:[#allocation19 + $0x8] sm:$0xff] }
  0xf5   :  { %1344 = vmatmul.mubr.msk.f32.vlgmr.msra.gmra.mrb[0].mxu0 %vm227_vm1, %v217_v2  ;;  %1463 = vmatprep.subr.bf16.mxu1 %v1462_v28  ;;  %v1474_v49 = vpack.c.bf16 %v877_v48, %v876_v47  ;;  %v1478_v56 = vpack.c.bf16 %v879_v51, %v878_v50  ;;  %v1046_v62 = vld [vmem:[#allocation19] sm:$0xff]  ;;  %v1048_v2 = vld [vmem:[#allocation19 + $0x10] sm:$0xff]  ;;  %v1273_v5 = vld [vmem:[#allocation16] ss:$0 sm:$0xff]  ;;  %p1830_p10 = pnand %p1829_p9, %p1823_p6 }
  0xf6   :  { %1453 = vmatpush3.bf16.msra.mxu0 %v1450_v10  ;;  %v1492_v1 = vpack.c.bf16 %v1047_v63, %v1046_v62 }
  0xf7   :  { %1359 = vmatprep.subr.bf16.mxu0 %v1923_v0 }
  0xf8   :  { %1465 = vmatpush3.bf16.msra.mxu1 %v1462_v28 }
  0xf9   :  { %1383 = vmatprep.subr.bf16.mxu1 %v1923_v0 }
 0x1c5   :  { %v354_v13 = vpop.f32.mrb[0].mxu1 }
 0x1c6   :  { %v1350_v14 = vpop.f32.mrb[1].mxu1  ;;  %1356 = vmatprep.mubr.msk.f32.mxu0 %vm227_vm1, %v354_v13 }
 0x1c7   :  { %v357_v16 = vpop.f32.mrb[2].mxu1  ;;  %v1050_v14 = vld [vmem:[#allocation20] sm:$0xff] }
 0x1c8   :  { %v1351_v17 = vpop.f32.mrb[3].mxu1  ;;  %1357 = vmatmul.mubr.msk.f32.vlgmr.msra.gmra.mrb[0].mxu0 %vm227_vm1, %v357_v16 }
 0x1c9   :  { %1360 = vmatpush3.bf16.msra.mxu0 %v309_v3  ;;  %1361 = vmatprep.mubr.msk.bf16.mxu0 %vm1924_vm0, %v1923_v0  ;;  %v1049_v3 = vld [vmem:[#allocation19 + $0x18] sm:$0xff]  ;;  %v971_v17 = vld [vmem:[#allocation7] sm:$0x3] }
 0x1ca   :  { %1455 = vmatprep.subr.bf16.mxu0 %v1454_v15  ;;  %v1495_v4 = vpack.c.bf16 %v1049_v3, %v1048_v2 }
 0x1cc   :  { %1362 = vmatmul.mubr.msk.bf16.vlgmr.msra.gmra.mrb[4].mxu0 %vm227_vm1, %v1533_v18 }
 0x1cd   :  { %1457 = vmatpush3.bf16.msra.mxu0 %v1454_v15  ;;  %v1051_v15 = vld [vmem:[#allocation20 + $0x8] sm:$0xff] }
 0x1ce   :  { %1400 = vmatprep.subr.bf16.mxu0 %v1923_v0  ;;  %v1486_v18 = vpack.c.bf16 %v1051_v15, %v1050_v14 }
 0x29f   :  { %v491_v19 = vpop.f32.mrb[4].mxu0 }
 0x2a0   :  { %v1363_v20 = vpop.f32.mrb[5].mxu0  ;;  %1369 = vmatprep.mubr.msk.f32.mxu0 %vm227_vm1, %v491_v19  ;;  %v1052_v19 = vld [vmem:[#allocation20 + $0x10] sm:$0xff] }
 0x2a1   :  { %v494_v21 = vpop.f32.mrb[6].mxu0  ;;  %v1053_v20 = vld [vmem:[#allocation20 + $0x18] sm:$0xff] }
 0x2a2   :  { %v1364_v22 = vpop.f32.mrb[7].mxu0  ;;  %1370 = vmatmul.mubr.msk.f32.vlgmr.msra.gmra.mrb[0].mxu0 %vm227_vm1, %v494_v21  ;;  %v1489_v21 = vpack.c.bf16 %v1053_v20, %v1052_v19 }
 0x2a3   :  { %1402 = vmatprep.mubr.msk.bf16.mxu0 %vm1924_vm0, %v1923_v0  ;;  %v1045_v22 = vld [vmem:[#allocation17] sm:$0x3] }
 0x375   :  { %v1371_v30 = vpop.f32.mrb[0].mxu0 }
 0x376   :  { %v1497_v31 = vadd.f32 %v1371_v30, %v1262_v29  ;;  %v573_v32 = vpop.f32.mrb[1].mxu0 }
 0x377   :  { %v1498_v33 = vadd.f32 %v1262_v29, %v573_v32 }
 0x378   :  { %vm585_vm2 = vcmp.ge.f32.partialorder %v1497_v31, 0.0  ;;  %v587_v34 = vmul.f32 0.22916667, %v1497_v31 }
 0x379   :  { %vm584_vm4 = vcmp.ge.f32.partialorder %v1498_v33, 0.0  ;;  %v586_v37 = vmul.f32 0.22916667, %v1498_v33 }
 0x37a   :  { %v589_v38 = vsel %vm585_vm2, %v1497_v31, %v587_v34 }
 0x37b   :  { %v588_v39 = vsel %vm584_vm4, %v1498_v33, %v586_v37  ;;  %592 = vst.msk [vmem:[#allocation23 + $0x8] sm:$0xff] %vm590_vm3, %v589_v38 }
 0x37c   :  { %1380 = vmatprep.mubr.msk.f32.mxu1 %vm590_vm3, %v588_v39  ;;  %v685_v41 = vpack.c.bf16 %v589_v38, %v588_v39  ;;  %591 = vst.msk [vmem:[#allocation23] sm:$0xff] %vm590_vm3, %v588_v39 }
 0x37d   :  { %1381 = vmatmul.mubr.msk.f32.vlgmr.msra.gmra.mrb[4].mxu1 %vm590_vm3, %v589_v38 }
 0x37e   :  { %1384 = vmatpush3.bf16.msra.mxu1 %v685_v41  ;;  %1401 = vmatpush3.bf16.msra.mxu0 %v685_v41 }
 0x37f   :  { %1385 = vmatprep.mubr.msk.bf16.mxu1 %vm1924_vm0, %v1923_v0  ;;  %1467 = vmatprep.subr.bf16.mxu1 %v1466_v40 }
 0x380   :  { %1482 = vmatprep.subr.bf16.mxu0 %v1925_v61 }
 0x381   :  { %1386 = vmatmul.mubr.msk.bf16.vlgmr.msra.gmra.mrb[8].mxu1 %vm227_vm1, %v1534_v44  ;;  %1403 = vmatmul.mubr.msk.bf16.vlgmr.msra.gmra.mrb[8].mxu0 %vm227_vm1, %v1535_v45 }
 0x382   :  { %1469 = vmatpush3.bf16.msra.mxu1 %v1466_v40  ;;  %1421 = vmatprep.mubr.msk.f32.mxu0 %vm1924_vm0, %v1923_v0 }
 0x383   :  { %1471 = vmatprep.subr.bf16.mxu1 %v1470_v46 }
 0x386   :  { %1473 = vmatpush3.bf16.msra.mxu1 %v1470_v46 }
 0x387   :  { %1475 = vmatprep.subr.bf16.mxu1 %v1474_v49 }
 0x454   :  { %v730_v52 = vpop.f32.mrb[8].mxu1  ;;  %v868_v53 = vpop.f32.mrb[8].mxu0 }
 0x455   :  { %v1387_v54 = vpop.f32.mrb[9].mxu1  ;;  %1397 = vmatprep.mubr.msk.f32.mxu1 %vm590_vm3, %v730_v52  ;;  %v1404_v55 = vpop.f32.mrb[9].mxu0 }
 0x456   :  { %v733_v57 = vpop.f32.mrb[10].mxu1  ;;  %v871_v58 = vpop.f32.mrb[10].mxu0 }
 0x457   :  { %v1388_v59 = vpop.f32.mrb[11].mxu1  ;;  %1398 = vmatmul.mubr.msk.f32.vlgmr.msra.gmra.mrb[4].mxu1 %vm590_vm3, %v733_v57  ;;  %v1405_v60 = vpop.f32.mrb[11].mxu0 }
 0x458   :  { %1477 = vmatpush3.bf16.msra.mxu1 %v1474_v49  ;;  %1414 = vmatprep.mubr.msk.f32.mxu1 %vm590_vm3, %v868_v53 }
 0x459   :  { %1479 = vmatprep.subr.bf16.mxu1 %v1478_v56 }
 0x45c   :  { %1481 = vmatpush3.bf16.msra.mxu1 %v1478_v56 }
 0x45d   :  { %1491 = vmatprep.subr.bf16.mxu1 %v1925_v61 }
 0x45f   :  { %1415 = vmatmul.mubr.msk.f32.vlgmr.msra.gmra.mrb[4].mxu1 %vm590_vm3, %v871_v58 }
 0x460   :  { %1443 = vmatprep.mubr.msk.f32.mxu1 %vm1924_vm0, %v1923_v0  ;;  %1493 = vmatpush3.bf16.msra.mxu1 %v1492_v1 }
 0x461   :  { %1494 = vmatprep.subr.bf16.mxu1 %v1925_v61 }
 0x464   :  { %1496 = vmatpush3.bf16.msra.mxu1 %v1495_v4 }
 0x532   :  { %v1416_v6 = vpop.f32.mrb[4].mxu1 }
 0x533   :  { %v1499_v7 = vadd.f32 %v1416_v6, %v1273_v5  ;;  %v952_v8 = vpop.f32.mrb[5].mxu1 }
 0x534   :  { %v1500_v9 = vadd.f32 %v1273_v5, %v952_v8 }
 0x535   :  { %vm964_vm5 = vcmp.ge.f32.partialorder %v1499_v7, 0.0  ;;  %v966_v10 = vmul.f32 0.22916667, %v1499_v7 }
 0x536   :  { %vm963_vm6 = vcmp.ge.f32.partialorder %v1500_v9, 0.0  ;;  %v965_v11 = vmul.f32 0.22916667, %v1500_v9 }
 0x537   :  { %v968_v12 = vsel %vm964_vm5, %v1499_v7, %v966_v10 }
 0x538   :  { %970 = vst.msk [vmem:[#allocation24 + $0x8] sm:$0xff] %vm590_vm3, %v968_v12  ;;  %v967_v13 = vsel %vm963_vm6, %v1500_v9, %v965_v11 }
 0x539   :  { %v1483_v16 = vpack.c.bf16 %v968_v12, %v967_v13  ;;  %969 = vst.msk [vmem:[#allocation24] sm:$0xff] %vm590_vm3, %v967_v13 }
 0x53b   :  { %1484 = vmatpush3.bf16.msra.mxu0 %v1483_v16 }
 0x53c   :  { %1485 = vmatprep.subr.bf16.mxu0 %v1925_v61 }
 0x53e   :  { %1422 = vmatmul.mubr.msk.f32.vlgmr.msra.gmra.mrb[2].mxu0 %vm227_vm1, %v971_v17 }
 0x53f   :  { %1487 = vmatpush3.bf16.msra.mxu0 %v1486_v18  ;;  %1432 = vmatprep.mubr.msk.f32.mxu0 %vm1924_vm0, %v1923_v0 }
 0x540   :  { %1488 = vmatprep.subr.bf16.mxu0 %v1925_v61 }
 0x543   :  { %1490 = vmatpush3.bf16.msra.mxu0 %v1489_v21 }
 0x546   :  { %1433 = vmatmul.mubr.msk.f32.vlgmr.msra.gmra.mrb[12].mxu0 %vm590_vm3, %v1045_v22 }
 0x611   :  { %v1041_v23 = vpop.f32.mrb[2].mxu0 }
 0x612   :  { %v1423_v24 = vpop.f32.mrb[3].mxu0  ;;  %1444 = vmatmul.mubr.msk.f32.vlgmr.msra.gmra.mrb[6].mxu1 %vm590_vm3, %v1041_v23 }
 0x619   :  { %v1123_v25 = vpop.f32.mrb[12].mxu0 }
 0x61a   :  { %v1434_v26 = vpop.f32.mrb[13].mxu0 }
 0x61b   :  { %1833 = shalt.err (!%p1830_p10)
}
 0x61c   :  { %s1834_s16 = scalar_lea.hbm %s2283_s14, 256 }
 0x61d   :  { %p1835_p11 = scmp.ne.s32.totalorder %s2283_s14, %s1834_s16  ;;  %p1838_p12 = scmp.lt.u32.totalorder %s1834_s16, %s2283_s14 }
 0x61f   :  { %p1840_p13 = pnand %p1838_p12, %p1835_p11 }
 0x621   :  { %1843 = shalt.err (!%p1840_p13)
}
 0x622   :  { %1233 = dma.vmem_to_hbm [thread:$0]  %s1228_s26, 256, %s2283_s14, [#allocation25], %s1911_s19, %s1911_s19, %s1912_s28  }
 0x623   :  { %s1844_s9 = scalar_lea.vmem %s1216_s27, 256  ;;  %p1849_p1 = scmp.lt.s32.totalorder %s1216_s27, %s1216_s27 }
 0x624   :  { %p1845_p0 = scmp.ne.s32.totalorder %s1216_s27, %s1844_s9  ;;  %p1850_p2 = scmp.lt.s32.totalorder %s1844_s9, %s1844_s9 }
 0x626   :  { %p1851_p3 = por %p1850_p2, %p1849_p1 }
 0x628   :  { %p1852_p4 = pnand %p1851_p3, %p1845_p0 }
 0x62a   :  { %1855 = shalt.err (!%p1852_p4)
}
 0x62b   :  { %s1856_s20 = scalar_lea.hbm %s2282_s13, 256 }
 0x62c   :  { %p1857_p5 = scmp.ne.s32.totalorder %s2282_s13, %s1856_s20  ;;  %p1860_p6 = scmp.lt.u32.totalorder %s1856_s20, %s2282_s13 }
 0x62e   :  { %p1862_p7 = pnand %p1860_p6, %p1857_p5 }
 0x630   :  { %1865 = shalt.err (!%p1862_p7)
}
 0x631   :  { %1221 = dma.vmem_to_hbm [thread:$0]  %s1216_s27, 256, %s2282_s13, [#allocation4], %s1911_s19, %s1911_s19, %s1912_s28   ;;  %v1287_v27 = vld [vmem:[#allocation22] ss:$0 sm:$0xff]  ;;  %vm1208_vm7 = vcmask 254976  }
 0x632   :  { %s1928_s2 = smov [#allocation26]  }
 0x633   :  { %s1240_s25 = sshll.u32 %s1928_s2, 4  ;;  %s1241_s25 = int_to_ptr.vmem [resolvable:$true] %s1240_s25 }
 0x634   :  { %s1866_s10 = scalar_lea.vmem %s1241_s25, 32  ;;  %p1871_p9 = scmp.lt.s32.totalorder %s1241_s25, %s1241_s25 }
 0x635   :  { %p1867_p8 = scmp.ne.s32.totalorder %s1241_s25, %s1866_s10  ;;  %p1872_p10 = scmp.lt.s32.totalorder %s1866_s10, %s1866_s10 }
 0x637   :  { %p1873_p11 = por %p1872_p10, %p1871_p9 }
 0x639   :  { %p1874_p12 = pnand %p1873_p11, %p1867_p8 }
 0x6e5   :  { %v1196_v0 = vpop.f32.mrb[6].mxu1 }
 0x6e6   :  { %v1197_v28 = vadd.f32 %v1196_v0, %v1123_v25  ;;  %v1445_v29 = vpop.f32.mrb[7].mxu1 }
 0x6e8   :  { %v1207_v30 = vadd.f32 %v1287_v27, %v1197_v28 }
 0x6ea   :  { %1209 = vst.msk [vmem:[#allocation26] sm:$0x3] %vm1208_vm7, %v1207_v30 }
 0x6eb   :  { %1877 = shalt.err (!%p1874_p12)
}
 0x6ec   :  { %s2287_s13 = sld [smem:[#allocation36_spill]] }
 0x6f2   :  { %s1878_s19 = scalar_lea.hbm %s2287_s13, 32 }
 0x6f3   :  { %p1879_p13 = scmp.ne.s32.totalorder %s2287_s13, %s1878_s19  ;;  %p1882_p0 = scmp.lt.u32.totalorder %s1878_s19, %s2287_s13 }
 0x6f5   :  { %p1884_p1 = pnand %p1882_p0, %p1879_p13 }
 0x6f7   :  { %1887 = shalt.err (!%p1884_p1)
}
 0x6f8   :  { %1243 = dma.vmem_to_hbm [thread:$0]  %s1241_s25, 32, %s2287_s13, [#allocation25]  }
 0x6f9   :  { %1902 = dma.done.wait [#allocation4], 256  }
 0x6fa   :  { %1903 = vsyncadd [#allocation4], 4294967040 }
 0x6fb   :  { %1904 = dma.done.wait [#allocation25], 288  }
 0x6fc   :  { %1905 = vsyncadd [#allocation25], 4294967008 }
 0x6fd   :  { %1253 = vsyncpa [#allocation3], 1 }
 0x6fe   :  { %1254 = vsyncpa [#allocation6], 1 }
 0x6ff   :  { %1255 = vsyncpa [#allocation9], 1 }
 0x700   :  { %1256 = vsyncpa [#allocation12], 1 }
 0x701   :  { %1257 = vsyncpa [#allocation15], 1 }
 0x702   :  { %1258 = vsyncpa [#allocation18], 1 }
 0x703   :  { %1259 = vsyncpa [#allocation21], 1 }
 0x704   :  { %1260 = vsyncpa [#allocation4], 1 }
 0x705   :  { %1261 = vsyncpa [#allocation25], 1 }

// kernel: regcn_forward.3
= control target key start
LH: loop header
LB: loop body
LE: loop exit
PB: predicated region body
PF: predicated region fallthrough
CT: control target
= control target key end

     0   :  { %s1513_s0 = inlined_call_operand.hbm [shape: f32[16,32], index: 0, kind: input, shape index: {}]   ;;  %s1514_s1 = inlined_call_operand.hbm [shape: f32[16,32], index: 1, kind: input, shape index: {}]   ;;  %s1515_s2 = inlined_call_operand.hbm [shape: f32[2,32], index: 2, kind: input, shape index: {}]   ;;  %s1516_s3 = inlined_call_operand.hbm [shape: f32[32,16], index: 3, kind: input, shape index: {}]   ;;  %s1517_s4 = inlined_call_operand.hbm [shape: f32[1,16], index: 4, kind: input, shape index: {}]   ;;  %s1518_s5 = inlined_call_operand.hbm [shape: f32[32,16], index: 5, kind: input, shape index: {}]   ;;  %s1519_s6 = inlined_call_operand.hbm [shape: f32[1,16], index: 6, kind: input, shape index: {}]   ;;  %s1520_s7 = inlined_call_operand.hbm [shape: f32[16,16], index: 7, kind: input, shape index: {}]   ;;  %s1521_s8 = inlined_call_operand.hbm [shape: f32[16,16], index: 8, kind: input, shape index: {}]   ;;  %s1522_s9 = inlined_call_operand.hbm [shape: f32[2,16], index: 9, kind: input, shape index: {}]   ;;  %s1523_s10 = inlined_call_operand.hbm [shape: f32[16,8], index: 10, kind: input, shape index: {}]   ;;  %s1524_s11 = inlined_call_operand.hbm [shape: f32[16,1], index: 11, kind: input, shape index: {}]   ;;  %s1525_s12 = inlined_call_operand.<no memory space> [shape: f32[1,1], index: 12, kind: input, shape index: {}]   ;;  %s1526_s13 = inlined_call_operand.hbm [shape: f32[2,8], index: 13, kind: output, shape index: {}]  }
   0x1   :  { %v18_v0 = vstv %s1525_s12 }
   0x2   :  { %19 = vst [vmem:[#allocation2] sm:$0x1] %v18_v0 }
   0x3   :  { %20 = vsyncpa [#allocation4], 0 }
   0x4   :  { %21 = vsyncpa [#allocation7], 0 }
   0x5   :  { %22 = vsyncpa [#allocation10], 0 }
   0x6   :  { %23 = vsyncpa [#allocation13], 0 }
   0x7   :  { %24 = vsyncpa [#allocation16], 0 }
   0x8   :  { %25 = vsyncpa [#allocation19], 0 }
   0x9   :  { %26 = vsyncpa [#allocation22], 0 }
   0xa   :  { %27 = vsyncpa [#allocation5], 0  ;;  %s1194_s27 = smov [#allocation6]   ;;  %s1195_s29 = smov [#allocation9]  }
   0xb   :  { %s45_s28 = sshll.u32 %s1194_s27, 4  ;;  %s67_s30 = sshll.u32 %s1195_s29, 4  ;;  %s46_s28 = int_to_ptr.vmem [resolvable:$true] %s45_s28  ;;  %s1286_s30 = int_to_ptr.vmem [resolvable:$true] %s67_s30 }
   0xc   :  { %s892_s12 = scalar_lea.hbm %s1514_s1, 256 }
   0xd   :  { %p893_p0 = scmp.ne.s32.totalorder %s1514_s1, %s892_s12  ;;  %p896_p1 = scmp.lt.u32.totalorder %s892_s12, %s1514_s1 }
   0xf   :  { %p898_p2 = pnand %p896_p1, %p893_p0 }
  0x11   :  { %901 = shalt.err (!%p898_p2)
}
  0x12   :  { %s902_s20 = scalar_lea.vmem %s46_s28, 256  ;;  %p907_p4 = scmp.lt.s32.totalorder %s46_s28, %s46_s28 }
  0x13   :  { %p903_p3 = scmp.ne.s32.totalorder %s46_s28, %s902_s20  ;;  %p908_p5 = scmp.lt.s32.totalorder %s902_s20, %s902_s20 }
  0x15   :  { %p909_p6 = por %p908_p5, %p907_p4 }
  0x17   :  { %p910_p7 = pnand %p909_p6, %p903_p3 }
  0x19   :  { %913 = shalt.err (!%p910_p7)
}
  0x1a   :  { %s1196_s21 = smov 128   ;;  %s1197_s22 = smov 8  }
  0x1b   :  { %51 = dma.hbm_to_vmem [thread:$0]  %s1514_s1, 256, %s46_s28, [#allocation7], %s1196_s21, %s1196_s21, %s1197_s22  }
  0x1c   :  { %s914_s27 = scalar_lea.hbm %s1516_s3, 512 }
  0x1d   :  { %p915_p8 = scmp.ne.s32.totalorder %s1516_s3, %s914_s27  ;;  %p918_p9 = scmp.lt.u32.totalorder %s914_s27, %s1516_s3 }
  0x1f   :  { %p920_p10 = pnand %p918_p9, %p915_p8 }
  0x21   :  { %923 = shalt.err (!%p920_p10)
}
  0x22   :  { %s924_s16 = scalar_lea.vmem %s1286_s30, 512  ;;  %p929_p12 = scmp.lt.s32.totalorder %s1286_s30, %s1286_s30 }
  0x23   :  { %p925_p11 = scmp.ne.s32.totalorder %s1286_s30, %s924_s16  ;;  %p930_p13 = scmp.lt.s32.totalorder %s924_s16, %s924_s16 }
  0x25   :  { %p931_p0 = por %p930_p13, %p929_p12 }
  0x27   :  { %p932_p1 = pnand %p931_p0, %p925_p11 }
  0x29   :  { %935 = shalt.err (!%p932_p1)
}
  0x2a   :  { %73 = dma.hbm_to_vmem [thread:$0]  %s1516_s3, 512, %s1286_s30, [#allocation10], %s1196_s21, %s1196_s21, %s1197_s22  }
  0x2b   :  { %s1198_s17 = smov [#allocation12]   ;;  %s1199_s19 = smov [#allocation15]  }
  0x2c   :  { %s89_s18 = sshll.u32 %s1198_s17, 4  ;;  %s111_s20 = sshll.u32 %s1199_s19, 4  ;;  %s90_s18 = int_to_ptr.vmem [resolvable:$true] %s89_s18  ;;  %s1323_s20 = int_to_ptr.vmem [resolvable:$true] %s111_s20 }
  0x2d   :  { %s936_s25 = scalar_lea.hbm %s1518_s5, 512 }
  0x2e   :  { %p937_p2 = scmp.ne.s32.totalorder %s1518_s5, %s936_s25  ;;  %p940_p3 = scmp.lt.u32.totalorder %s936_s25, %s1518_s5 }
  0x30   :  { %p942_p4 = pnand %p940_p3, %p937_p2 }
  0x32   :  { %945 = shalt.err (!%p942_p4)
}
  0x33   :  { %s946_s3 = scalar_lea.vmem %s90_s18, 512  ;;  %p951_p6 = scmp.lt.s32.totalorder %s90_s18, %s90_s18 }
  0x34   :  { %p947_p5 = scmp.ne.s32.totalorder %s90_s18, %s946_s3  ;;  %p952_p7 = scmp.lt.s32.totalorder %s946_s3, %s946_s3 }
  0x36   :  { %p953_p8 = por %p952_p7, %p951_p6 }
  0x38   :  { %p954_p9 = pnand %p953_p8, %p947_p5 }
  0x3a   :  { %957 = shalt.err (!%p954_p9)
}
  0x3b   :  { %95 = dma.hbm_to_vmem [thread:$0]  %s1518_s5, 512, %s90_s18, [#allocation13], %s1196_s21, %s1196_s21, %s1197_s22  }
  0x3c   :  { %s958_s1 = scalar_lea.hbm %s1520_s7, 256 }
  0x3d   :  { %p959_p10 = scmp.ne.s32.totalorder %s1520_s7, %s958_s1  ;;  %p962_p11 = scmp.lt.u32.totalorder %s958_s1, %s1520_s7 }
  0x3f   :  { %p964_p12 = pnand %p962_p11, %p959_p10 }
  0x41   :  { %967 = shalt.err (!%p964_p12)
}
  0x42   :  { %s968_s24 = scalar_lea.vmem %s1323_s20, 256  ;;  %p973_p0 = scmp.lt.s32.totalorder %s1323_s20, %s1323_s20 }
  0x43   :  { %p969_p13 = scmp.ne.s32.totalorder %s1323_s20, %s968_s24  ;;  %p974_p1 = scmp.lt.s32.totalorder %s968_s24, %s968_s24 }
  0x45   :  { %p975_p2 = por %p974_p1, %p973_p0 }
  0x47   :  { %p976_p3 = pnand %p975_p2, %p969_p13 }
  0x49   :  { %979 = shalt.err (!%p976_p3)
}
  0x4a   :  { %117 = dma.hbm_to_vmem [thread:$0]  %s1520_s7, 256, %s1323_s20, [#allocation16], %s1196_s21, %s1196_s21, %s1197_s22  }
  0x4b   :  { %s1200_s25 = smov [#allocation18]   ;;  %s1201_s27 = smov [#allocation3]  }
  0x4c   :  { %s136_s26 = sshll.u32 %s1200_s25, 4  ;;  %s33_s29 = sshll.u32 %s1201_s27, 4  ;;  %s137_s26 = int_to_ptr.vmem [resolvable:$true] %s136_s26  ;;  %s1360_s29 = int_to_ptr.vmem [resolvable:$true] %s33_s29 }
  0x4d   :  { %s980_s30 = scalar_lea.hbm %s1522_s9, 32 }
  0x4e   :  { %p981_p4 = scmp.ne.s32.totalorder %s1522_s9, %s980_s30  ;;  %p984_p5 = scmp.lt.u32.totalorder %s980_s30, %s1522_s9 }
  0x50   :  { %p986_p6 = pnand %p984_p5, %p981_p4 }
  0x52   :  { %989 = shalt.err (!%p986_p6)
}
  0x53   :  { %s990_s7 = scalar_lea.vmem %s137_s26, 32  ;;  %p995_p8 = scmp.lt.s32.totalorder %s137_s26, %s137_s26 }
  0x54   :  { %p991_p7 = scmp.ne.s32.totalorder %s137_s26, %s990_s7  ;;  %p996_p9 = scmp.lt.s32.totalorder %s990_s7, %s990_s7 }
  0x56   :  { %p997_p10 = por %p996_p9, %p995_p8 }
  0x58   :  { %p998_p11 = pnand %p997_p10, %p991_p7 }
  0x5a   :  { %1001 = shalt.err (!%p998_p11)
}
  0x5b   :  { %139 = dma.hbm_to_vmem [thread:$0]  %s1522_s9, 32, %s137_s26, [#allocation19]  }
  0x5c   :  { %s1002_s23 = scalar_lea.hbm %s1513_s0, 256 }
  0x5d   :  { %p1003_p12 = scmp.ne.s32.totalorder %s1513_s0, %s1002_s23  ;;  %p1006_p13 = scmp.lt.u32.totalorder %s1002_s23, %s1513_s0 }
  0x5f   :  { %p1008_p0 = pnand %p1006_p13, %p1003_p12 }
  0x61   :  { %1011 = shalt.err (!%p1008_p0)
}
  0x62   :  { %s1012_s27 = scalar_lea.vmem %s1360_s29, 256  ;;  %p1017_p2 = scmp.lt.s32.totalorder %s1360_s29, %s1360_s29 }
  0x63   :  { %p1013_p1 = scmp.ne.s32.totalorder %s1360_s29, %s1012_s27  ;;  %p1018_p3 = scmp.lt.s32.totalorder %s1012_s27, %s1012_s27 }
  0x65   :  { %p1019_p4 = por %p1018_p3, %p1017_p2 }
  0x67   :  { %p1020_p5 = pnand %p1019_p4, %p1013_p1 }
  0x69   :  { %1023 = shalt.err (!%p1020_p5)
}
  0x6a   :  { %39 = dma.hbm_to_vmem [thread:$0]  %s1513_s0, 256, %s1360_s29, [#allocation4], %s1196_s21, %s1196_s21, %s1197_s22  }
  0x6b   :  { %s1202_s14 = smov [#allocation8]   ;;  %s1203_s30 = smov [#allocation11]  }
  0x6c   :  { %s58_s3 = sshll.u32 %s1202_s14, 4  ;;  %s80_s15 = sshll.u32 %s1203_s30, 4  ;;  %s59_s3 = int_to_ptr.vmem [resolvable:$true] %s58_s3  ;;  %s81_s15 = int_to_ptr.vmem [resolvable:$true] %s80_s15 }
  0x6d   :  { %s1024_s1 = scalar_lea.hbm %s1515_s2, 32 }
  0x6e   :  { %p1025_p6 = scmp.ne.s32.totalorder %s1515_s2, %s1024_s1  ;;  %p1028_p7 = scmp.lt.u32.totalorder %s1024_s1, %s1515_s2 }
  0x70   :  { %p1030_p8 = pnand %p1028_p7, %p1025_p6 }
  0x72   :  { %1033 = shalt.err (!%p1030_p8)
}
  0x73   :  { %s1034_s0 = scalar_lea.vmem %s59_s3, 32  ;;  %p1039_p10 = scmp.lt.s32.totalorder %s59_s3, %s59_s3 }
  0x74   :  { %p1035_p9 = scmp.ne.s32.totalorder %s59_s3, %s1034_s0  ;;  %p1040_p11 = scmp.lt.s32.totalorder %s1034_s0, %s1034_s0 }
  0x76   :  { %p1041_p12 = por %p1040_p11, %p1039_p10 }
  0x78   :  { %p1042_p13 = pnand %p1041_p12, %p1035_p9 }
  0x7a   :  { %1045 = shalt.err (!%p1042_p13)
}
  0x7b   :  { %61 = dma.hbm_to_vmem [thread:$0]  %s1515_s2, 32, %s59_s3, [#allocation7]  }
  0x7c   :  { %s1046_s5 = scalar_lea.hbm %s1517_s4, 16 }
  0x7d   :  { %p1047_p0 = scmp.ne.s32.totalorder %s1517_s4, %s1046_s5  ;;  %p1050_p1 = scmp.lt.u32.totalorder %s1046_s5, %s1517_s4 }
  0x7f   :  { %p1052_p2 = pnand %p1050_p1, %p1047_p0 }
  0x81   :  { %1055 = shalt.err (!%p1052_p2)
}
  0x82   :  { %s1056_s26 = scalar_lea.vmem %s81_s15, 16  ;;  %s1060_s14 = scalar_lea.vmem %s81_s15, 32 }
  0x83   :  { %p1057_p3 = scmp.ne.s32.totalorder %s81_s15, %s1056_s26  ;;  %p1061_p4 = scmp.lt.s32.totalorder %s81_s15, %s81_s15 }
  0x84   :  { %p1062_p5 = scmp.lt.s32.totalorder %s1060_s14, %s1056_s26 }
  0x86   :  { %p1063_p6 = por %p1062_p5, %p1061_p4 }
  0x88   :  { %p1064_p7 = pnand %p1063_p6, %p1057_p3 }
  0x8a   :  { %1067 = shalt.err (!%p1064_p7)
}
  0x8b   :  { %83 = dma.hbm_to_vmem [thread:$0]  %s1517_s4, 16, %s81_s15, [#allocation10]  }
  0x8c   :  { %s1204_s30 = smov [#allocation14]   ;;  %s1205_s16 = smov [#allocation17]  }
  0x8d   :  { %s102_s12 = sshll.u32 %s1204_s30, 4  ;;  %s123_s1 = sshll.u32 %s1205_s16, 4  ;;  %s103_s12 = int_to_ptr.vmem [resolvable:$true] %s102_s12  ;;  %s1418_s1 = int_to_ptr.vmem [resolvable:$true] %s123_s1 }
  0x8e   :  { %s1068_s28 = scalar_lea.hbm %s1519_s6, 16 }
  0x8f   :  { %p1069_p8 = scmp.ne.s32.totalorder %s1519_s6, %s1068_s28  ;;  %p1072_p9 = scmp.lt.u32.totalorder %s1068_s28, %s1519_s6 }
  0x91   :  { %p1074_p10 = pnand %p1072_p9, %p1069_p8 }
  0x93   :  { %1077 = shalt.err (!%p1074_p10)
}
  0x94   :  { %s1078_s4 = scalar_lea.vmem %s103_s12, 16  ;;  %s1082_s15 = scalar_lea.vmem %s103_s12, 32 }
  0x95   :  { %p1079_p11 = scmp.ne.s32.totalorder %s103_s12, %s1078_s4  ;;  %p1083_p12 = scmp.lt.s32.totalorder %s103_s12, %s103_s12 }
  0x96   :  { %p1084_p13 = scmp.lt.s32.totalorder %s1082_s15, %s1078_s4 }
  0x98   :  { %p1085_p0 = por %p1084_p13, %p1083_p12 }
  0x9a   :  { %p1086_p1 = pnand %p1085_p0, %p1079_p11 }
  0x9c   :  { %1089 = shalt.err (!%p1086_p1)
}
  0x9d   :  { %105 = dma.hbm_to_vmem [thread:$0]  %s1519_s6, 16, %s103_s12, [#allocation13]  }
  0x9e   :  { %s1090_s25 = scalar_lea.hbm %s1521_s8, 256 }
  0x9f   :  { %p1091_p2 = scmp.ne.s32.totalorder %s1521_s8, %s1090_s25  ;;  %p1094_p3 = scmp.lt.u32.totalorder %s1090_s25, %s1521_s8 }
  0xa1   :  { %p1096_p4 = pnand %p1094_p3, %p1091_p2 }
  0xa3   :  { %1099 = shalt.err (!%p1096_p4)
}
  0xa4   :  { %s1100_s2 = scalar_lea.vmem %s1418_s1, 256  ;;  %p1105_p6 = scmp.lt.s32.totalorder %s1418_s1, %s1418_s1 }
  0xa5   :  { %p1101_p5 = scmp.ne.s32.totalorder %s1418_s1, %s1100_s2  ;;  %p1106_p7 = scmp.lt.s32.totalorder %s1100_s2, %s1100_s2 }
  0xa7   :  { %p1107_p8 = por %p1106_p7, %p1105_p6 }
  0xa9   :  { %p1108_p9 = pnand %p1107_p8, %p1101_p5 }
  0xab   :  { %1111 = shalt.err (!%p1108_p9)
}
  0xac   :  { %129 = dma.hbm_to_vmem [thread:$0]  %s1521_s8, 256, %s1418_s1, [#allocation16], %s1196_s21, %s1196_s21, %s1197_s22  }
  0xad   :  { %s1206_s30 = smov [#allocation20]   ;;  %s1207_s16 = smov [#allocation21]  }
  0xae   :  { %s145_s12 = sshll.u32 %s1206_s30, 4  ;;  %s157_s7 = sshll.u32 %s1207_s16, 4  ;;  %s146_s12 = int_to_ptr.vmem [resolvable:$true] %s145_s12  ;;  %s1452_s7 = int_to_ptr.vmem [resolvable:$true] %s157_s7 }
  0xaf   :  { %s1112_s17 = scalar_lea.hbm %s1523_s10, 256 }
  0xb0   :  { %p1113_p10 = scmp.ne.s32.totalorder %s1523_s10, %s1112_s17  ;;  %p1116_p11 = scmp.lt.u32.totalorder %s1112_s17, %s1523_s10 }
  0xb2   :  { %p1118_p12 = pnand %p1116_p11, %p1113_p10 }
  0xb4   :  { %1121 = shalt.err (!%p1118_p12)
}
  0xb5   :  { %s1122_s8 = scalar_lea.vmem %s146_s12, 256  ;;  %p1127_p0 = scmp.lt.s32.totalorder %s146_s12, %s146_s12 }
  0xb6   :  { %p1123_p13 = scmp.ne.s32.totalorder %s146_s12, %s1122_s8  ;;  %p1128_p1 = scmp.lt.s32.totalorder %s1122_s8, %s1122_s8 }
  0xb8   :  { %p1129_p2 = por %p1128_p1, %p1127_p0 }
  0xba   :  { %p1130_p3 = pnand %p1129_p2, %p1123_p13 }
  0xbc   :  { %1133 = shalt.err (!%p1130_p3)
}
  0xbd   :  { %151 = dma.hbm_to_vmem [thread:$0]  %s1523_s10, 256, %s146_s12, [#allocation19], %s1196_s21, %s1196_s21, %s1197_s22  }
  0xbe   :  { %s1134_s5 = scalar_lea.hbm %s1524_s11, 256 }
  0xbf   :  { %p1135_p4 = scmp.ne.s32.totalorder %s1524_s11, %s1134_s5  ;;  %p1138_p5 = scmp.lt.u32.totalorder %s1134_s5, %s1524_s11 }
  0xc1   :  { %p1140_p6 = pnand %p1138_p5, %p1135_p4 }
  0xc3   :  { %1143 = shalt.err (!%p1140_p6)
}
  0xc4   :  { %s1144_s26 = scalar_lea.vmem %s1452_s7, 256  ;;  %p1149_p8 = scmp.lt.s32.totalorder %s1452_s7, %s1452_s7 }
  0xc5   :  { %p1145_p7 = scmp.ne.s32.totalorder %s1452_s7, %s1144_s26  ;;  %p1150_p9 = scmp.lt.s32.totalorder %s1144_s26, %s1144_s26 }
  0xc7   :  { %p1151_p10 = por %p1150_p9, %p1149_p8 }
  0xc9   :  { %p1152_p11 = pnand %p1151_p10, %p1145_p7 }
  0xcb   :  { %1155 = shalt.err (!%p1152_p11)
}
  0xcc   :  { %163 = dma.hbm_to_vmem [thread:$0]  %s1524_s11, 256, %s1452_s7, [#allocation22], %s1196_s21, %s1196_s21, %s1197_s22  }
  0xcd   :  { %1178 = dma.done.wait [#allocation4], 256  }
  0xce   :  { %1179 = vsyncadd [#allocation4], 4294967040 }
  0xcf   :  { %1180 = dma.done.wait [#allocation7], 288  }
  0xd0   :  { %1181 = vsyncadd [#allocation7], 4294967008 }
  0xd1   :  { %1182 = dma.done.wait [#allocation10], 528  }
  0xd2   :  { %1183 = vsyncadd [#allocation10], 4294966768 }
  0xd3   :  { %1184 = dma.done.wait [#allocation13], 528  }
  0xd4   :  { %1185 = vsyncadd [#allocation13], 4294966768 }
  0xd5   :  { %1186 = dma.done.wait [#allocation16], 512  }
  0xd6   :  { %1187 = vsyncadd [#allocation16], 4294966784 }
  0xd7   :  { %1188 = dma.done.wait [#allocation19], 288  }
  0xd8   :  { %1189 = vsyncadd [#allocation19], 4294967008 }
  0xd9   :  { %1190 = dma.done.wait [#allocation22], 256  }
  0xda   :  { %1191 = vsyncadd [#allocation22], 4294967040  ;;  %vm215_vm0 = vcmask 261120   ;;  %v204_v1 = vld [vmem:[#allocation9] sm:$0xff]  ;;  %v205_v2 = vld [vmem:[#allocation9 + $0x8] sm:$0xff]  ;;  %v1208_v14 = vmov 0.0|0.0  }
  0xdb   :  { %v206_v3 = vld [vmem:[#allocation9 + $0x10] sm:$0xff]  ;;  %v840_v4 = vpack.c.bf16 %v205_v2, %v204_v1  ;;  %v207_v5 = vld [vmem:[#allocation9 + $0x18] sm:$0xff]  ;;  %v476_v9 = vld [vmem:[#allocation12] sm:$0xff]  ;;  %vm1209_vm1 = vmmov 0   ;;  %v1210_v18 = vmov 0.0   ;;  %vm393_vm2 = vcmask 130048  }
  0xdc   :  { %v202_v6 = vld [vmem:[#allocation3] sm:$0xff]  ;;  %v297_v7 = vld [vmem:[#allocation6] sm:$0xff]  ;;  %v844_v8 = vpack.c.bf16 %v207_v5, %v206_v3  ;;  %v203_v11 = vld [vmem:[#allocation3 + $0x8] sm:$0xff]  ;;  %v1211_v49 = vmov 0   ;;  %s1212_s11 = smov [#allocation23]   ;;  %vm724_vm3 = vcmask 58368  }
  0xdd   :  { %794 = vmatprep.mubr.msk.f32.mxu0 %vm215_vm0, %v202_v6  ;;  %805 = vmatprep.mubr.msk.f32.mxu1 %vm215_vm0, %v297_v7  ;;  %v477_v10 = vld [vmem:[#allocation12 + $0x8] sm:$0xff]  ;;  %v298_v12 = vld [vmem:[#allocation6 + $0x8] sm:$0xff]  ;;  %v475_v19 = vld [vmem:[#allocation8] sm:$0x3]  ;;  %s732_s21 = sshll.u32 %s1212_s11, 4  ;;  %s733_s21 = int_to_ptr.vmem [resolvable:$true] %s732_s21 }
  0xde   :  { %841 = vmatprep.subr.bf16.mxu0 %v840_v4  ;;  %849 = vmatprep.subr.bf16.mxu1 %v840_v4  ;;  %v861_v13 = vpack.c.bf16 %v477_v10, %v476_v9  ;;  %v478_v15 = vld [vmem:[#allocation12 + $0x10] sm:$0xff]  ;;  %v479_v16 = vld [vmem:[#allocation12 + $0x18] sm:$0xff]  ;;  %v391_v20 = vld [vmem:[#allocation20] sm:$0xff]  ;;  %s1156_s22 = scalar_lea.vmem %s733_s21, 32  ;;  %p1161_p13 = scmp.lt.s32.totalorder %s733_s21, %s733_s21 }
  0xdf   :  { %843 = vmatpush3.bf16.msra.mxu0 %v840_v4  ;;  %851 = vmatpush3.bf16.msra.mxu1 %v840_v4  ;;  %v864_v17 = vpack.c.bf16 %v479_v16, %v478_v15  ;;  %v392_v21 = vld [vmem:[#allocation20 + $0x8] sm:$0xff]  ;;  %v747_v23 = vld [vmem:[#allocation11] ss:$0 sm:$0xff]  ;;  %v380_v31 = vld [vmem:[#allocation15] sm:$0xff]  ;;  %p1157_p12 = scmp.ne.s32.totalorder %s733_s21, %s1156_s22  ;;  %p1162_p0 = scmp.lt.s32.totalorder %s1156_s22, %s1156_s22 }
  0xe0   :  { %845 = vmatprep.subr.bf16.mxu0 %v844_v8  ;;  %853 = vmatprep.subr.bf16.mxu1 %v844_v8  ;;  %v856_v22 = vpack.c.bf16 %v392_v21, %v391_v20  ;;  %v381_v25 = vld [vmem:[#allocation15 + $0x8] sm:$0xff]  ;;  %v385_v27 = vld [vmem:[#allocation17 + $0x8] sm:$0xff]  ;;  %v384_v33 = vld [vmem:[#allocation17] sm:$0xff] }
  0xe1   :  { %v560_v38 = vld [vmem:[#allocation21] sm:$0xff]  ;;  %v561_v39 = vld [vmem:[#allocation21 + $0x8] sm:$0xff]  ;;  %891 = vset.pattern.permute.xlu0 %v1211_v49  ;;  %p1163_p1 = por %p1162_p0, %p1161_p13 }
  0xe2   :  { %v754_v44 = vld [vmem:[#allocation14] ss:$0 sm:$0xff]  ;;  %v867_v45 = vpack.c.bf16 %v561_v39, %v560_v38  ;;  %v390_v53 = vld [vmem:[#allocation18] sm:$0x3]  ;;  %v758_v56 = vld [vmem:[#allocation2] ss:$0 sm:$0xff] }
  0xe3   :  { %847 = vmatpush3.bf16.msra.mxu0 %v844_v8  ;;  %855 = vmatpush3.bf16.msra.mxu1 %v844_v8  ;;  %p1164_p2 = pnand %p1163_p1, %p1157_p12 }
  0xe4   :  { %860 = vmatprep.subr.bf16.mxu1 %v1208_v14  ;;  %857 = vmatprep.subr.bf16.mxu0 %v856_v22 }
  0xe6   :  { %795 = vmatmul.mubr.msk.f32.vlgmr.msra.gmra.mrb[0].mxu0 %vm215_vm0, %v203_v11  ;;  %806 = vmatmul.mubr.msk.f32.vlgmr.msra.gmra.mrb[0].mxu1 %vm215_vm0, %v298_v12 }
  0xe7   :  { %862 = vmatpush3.bf16.msra.mxu1 %v861_v13  ;;  %823 = vmatprep.mubr.msk.f32.mxu1 %vm1209_vm1, %v1210_v18 }
  0xe8   :  { %863 = vmatprep.subr.bf16.mxu1 %v1208_v14  ;;  %859 = vmatpush3.bf16.msra.mxu0 %v856_v22 }
  0xe9   :  { %866 = vmatprep.subr.bf16.mxu0 %v1208_v14 }
  0xeb   :  { %865 = vmatpush3.bf16.msra.mxu1 %v864_v17 }
  0xee   :  { %824 = vmatmul.mubr.msk.f32.vlgmr.msra.gmra.mrb[2].mxu1 %vm215_vm0, %v475_v19 }
 0x1b9   :  { %v796_v24 = vpop.f32.mrb[0].mxu0  ;;  %v807_v26 = vpop.f32.mrb[0].mxu1 }
 0x1ba   :  { %v294_v28 = vadd.f32 %v796_v24, %v747_v23  ;;  %v377_v29 = vadd.f32 %v807_v26, %v747_v23  ;;  %v288_v30 = vpop.f32.mrb[1].mxu0  ;;  %v371_v32 = vpop.f32.mrb[1].mxu1 }
 0x1bb   :  { %v289_v34 = vadd.f32 %v747_v23, %v288_v30  ;;  %v372_v35 = vadd.f32 %v747_v23, %v371_v32 }
 0x1bc   :  { %v383_v36 = vmul.f32 %v381_v25, %v294_v28  ;;  %v387_v37 = vmul.f32 %v385_v27, %v377_v29 }
 0x1bd   :  { %v382_v40 = vmul.f32 %v380_v31, %v289_v34  ;;  %v386_v41 = vmul.f32 %v384_v33, %v372_v35 }
 0x1be   :  { %v389_v42 = vadd.f32 %v387_v37, %v383_v36 }
 0x1bf   :  { %v388_v43 = vadd.f32 %v386_v41, %v382_v40 }
 0x1c1   :  { %812 = vmatprep.mubr.msk.f32.mxu0 %vm393_vm2, %v388_v43  ;;  %v556_v46 = vpop.f32.mrb[2].mxu1 }
 0x1c2   :  { %813 = vmatmul.mubr.msk.f32.vlgmr.msra.gmra.mrb[2].mxu0 %vm393_vm2, %v389_v42  ;;  %v557_v47 = vadd.f32 %v754_v44, %v556_v46  ;;  %v825_v48 = vpop.f32.mrb[3].mxu1 }
 0x1c3   :  { %868 = vmatpush3.bf16.msra.mxu0 %v867_v45  ;;  %830 = vmatprep.mubr.msk.f32.mxu0 %vm1209_vm1, %v1210_v18 }
 0x1c4   :  { %869 = vmatprep.subr.bf16.mxu0 %v1208_v14 }
 0x1c6   :  { %831 = vmatmul.mubr.msk.f32.vlgmr.msra.gmra.mrb[4].mxu0 %vm393_vm2, %v557_v47 }
 0x1c7   :  { %837 = vmatprep.mubr.msk.f32.mxu0 %vm1209_vm1, %v1210_v18 }
 0x295   :  { %v814_v50 = vpop.f32.mrb[2].mxu0 }
 0x296   :  { %v466_v51 = vpop.f32.mrb[3].mxu0 }
 0x297   :  { %v870_v52 = vpack.c.bf16 %v814_v50, %v466_v51 }
 0x299   :  { %871 = vmatpush3.bf16.msra.mxu0 %v870_v52  ;;  %v631_v54 = vpop.f32.mrb[4].mxu0 }
 0x29a   :  { %637 = vperm.xlu0 %891, %v631_v54   ;;  %v832_v55 = vpop.f32.mrb[5].mxu0 }
 0x29c   :  { %838 = vmatmul.mubr.msk.f32.vlgmr.msra.gmra.mrb[6].mxu0 %vm393_vm2, %v390_v53 }
 0x29e   :  { %720 = vperm.xlu0 %891, %v758_v56  }
 0x319   :  { %v638_v57 = vpop.permute.xlu0 %637 }
 0x31d   :  { %v721_v61 = vpop.permute.xlu0 %720 }
 0x36f   :  { %v709_v58 = vpop.f32.mrb[6].mxu0 }
 0x370   :  { %v710_v59 = vadd.f32 %v709_v58, %v638_v57  ;;  %v839_v60 = vpop.f32.mrb[7].mxu0 }
 0x372   :  { %v723_v62 = vadd.f32 %v721_v61, %v710_v59 }
 0x374   :  { %725 = vst.msk [vmem:[#allocation23] sm:$0x3] %vm724_vm3, %v723_v62 }
 0x375   :  { %1167 = shalt.err (!%p1164_p2)
}
 0x376   :  { %s1168_s3 = scalar_lea.hbm %s1526_s13, 32 }
 0x377   :  { %p1169_p3 = scmp.ne.s32.totalorder %s1526_s13, %s1168_s3  ;;  %p1172_p4 = scmp.lt.u32.totalorder %s1168_s3, %s1526_s13 }
 0x379   :  { %p1174_p5 = pnand %p1172_p4, %p1169_p3 }
 0x37b   :  { %1177 = shalt.err (!%p1174_p5)
}
 0x37c   :  { %735 = dma.vmem_to_hbm [thread:$0]  %s733_s21, 32, %s1526_s13, [#allocation5]  }
 0x37d   :  { %1192 = dma.done.wait [#allocation5], 32  }
 0x37e   :  { %1193 = vsyncadd [#allocation5], 4294967264 }
 0x37f   :  { %739 = vsyncpa [#allocation4], 1 }
 0x380   :  { %740 = vsyncpa [#allocation7], 1 }
 0x381   :  { %741 = vsyncpa [#allocation10], 1 }
 0x382   :  { %742 = vsyncpa [#allocation13], 1 }
 0x383   :  { %743 = vsyncpa [#allocation16], 1 }
 0x384   :  { %744 = vsyncpa [#allocation19], 1 }
 0x385   :  { %745 = vsyncpa [#allocation22], 1 }
 0x386   :  { %746 = vsyncpa [#allocation5], 1 }

</bundles_post_ra>
